<compile_context>
chip_gen: v7x
topology: tpu7x:2x2x1
jax: 0.10.0
libtpu: 0.0.40
codegen_flags: <defaults>
</compile_context>

<pallas_src>
import functools

import jax
import jax.numpy as jnp
from jax import lax
from jax.experimental import pallas as pl
from jax.scipy.linalg import block_diag


def _fs(shape):
    # Full-array BlockSpec (grid=() -> index_map takes no args).
    return pl.BlockSpec(shape, lambda *_: (0,) * len(shape))


def _sum_all(x):
    # [R, C] -> [1, 1] via staged lane-then-sublane reductions.
    return jnp.sum(jnp.sum(x, axis=1, keepdims=True), axis=0, keepdims=True)


# ------------------------- fused Pallas kernel -------------------------

def sapnet_fused_kernel(data_ref, a_ref, mask_ref, sel_t_ref, dmask_ref,
                        w_emb1_ref, b_emb1_ref, w_emb2_ref, b_emb2_ref,
                        w_gcn0_ref, w_gcnr_ref, b_gcn_ref,
                        wq_ref, wk_ref, wv_ref, wo_ref,
                        w_head_ref, b_head_ref, w_fc_ref, b_fc_ref,
                        logp_ref, div_ref):
    f32 = jnp.float32
    N = data_ref.shape[0]
    H = w_emb1_ref.shape[1]
    CH = w_gcn0_ref.shape[1]          # C * H
    C = CH // H
    B = mask_ref.shape[0]
    CD = wq_ref.shape[1]              # C * d_kv
    d_kv = CD // C
    n_rest = w_gcnr_ref.shape[0]      # L - 1

    nt = (((1,), (1,)), ((), ()))     # A @ B^T   (contract last dims)
    tn = (((0,), (0,)), ((), ()))     # A^T @ B   (contract first dims)

    # ---- 1. fea_embed: Linear(in_dim, H) -> Linear(H, H) ----
    emb = jnp.dot(data_ref[...], w_emb1_ref[...],
                  preferred_element_type=f32) + b_emb1_ref[...]
    emb = jnp.dot(emb, w_emb2_ref[...],
                  preferred_element_type=f32) + b_emb2_ref[...]

    # ---- 2. MultiGCNLayers: C GCN stacks as L wide lane-stacked matmuls ----
    a = a_ref[...]
    hw = jnp.dot(emb, w_gcn0_ref[...], preferred_element_type=f32)          # [N, C*H]
    h_all = jnp.maximum(
        jnp.dot(a, hw, preferred_element_type=f32) + b_gcn_ref[0], 0.0)
    for l in range(n_rest):
        hw = jnp.dot(h_all, w_gcnr_ref[l], preferred_element_type=f32)      # block-diag
        h_all = jnp.maximum(
            jnp.dot(a, hw, preferred_element_type=f32) + b_gcn_ref[l + 1], 0.0)
    z_all = h_all                                                            # [N, C*H]

    # ---- 3. diversity (correlation) loss via one Gram matmul ----
    sel_t = sel_t_ref[...]                                   # [C, C*H] block selectors
    col_sums = jnp.sum(z_all, axis=0, keepdims=True)         # [1, C*H]
    ch_means = lax.dot_general(col_sums, sel_t, nt,
                               preferred_element_type=f32) * (1.0 / float(N * H))
    cent = z_all - jnp.dot(ch_means, sel_t, preferred_element_type=f32)      # center per channel
    gram = lax.dot_general(cent, cent, tn, preferred_element_type=f32)       # [C*H, C*H]
    gram = gram * dmask_ref[...]                              # keep intra-block diagonals
    g = lax.dot_general(jnp.dot(sel_t, gram, preferred_element_type=f32),
                        sel_t, nt, preferred_element_type=f32)               # [C, C] block traces
    eye_c = (lax.broadcasted_iota(jnp.int32, (C, C), 0)
             == lax.broadcasted_iota(jnp.int32, (C, C), 1)).astype(f32)
    gd = g * eye_c
    ss_col = jnp.sum(gd, axis=1, keepdims=True) + 1e-12       # [C, 1]
    ss_row = jnp.sum(gd, axis=0, keepdims=True) + 1e-12       # [1, C]
    corr = g * lax.rsqrt(ss_col * ss_row)
    n_off = max(C * (C - 1), 1)
    div_ref[...] = _sum_all(jnp.abs(corr) * (1.0 - eye_c)) * (1.0 / float(n_off))

    # ---- 4. VLR attention readout (stacked projections, per-channel softmax) ----
    mask = mask_ref[...]                                      # [B, N]
    counts = jnp.sum(mask, axis=1, keepdims=True)             # [B, 1]
    inv_counts = pl.reciprocal(jnp.maximum(counts, 1.0), approx=True)
    scale = 1.0 / float(d_kv) ** 0.5

    k_all = jnp.dot(z_all, wk_ref[...], preferred_element_type=f32)          # [N, C*dkv]
    v_all = jnp.dot(z_all, wv_ref[...], preferred_element_type=f32)          # [N, C*dkv]
    q_in = jnp.dot(mask, z_all, preferred_element_type=f32) * inv_counts     # [B, C*H]
    q_all = jnp.dot(q_in, wq_ref[...], preferred_element_type=f32) * scale   # [B, C*dkv]

    vlr_all = jnp.zeros((B, CH), f32)
    for c in range(C):
        lo, hi = c * d_kv, (c + 1) * d_kv
        scores = lax.dot_general(q_all[:, lo:hi], k_all[:, lo:hi], nt,
                                 preferred_element_type=f32)                 # [B, N]
        scores = jnp.where(mask > 0.0, scores, -1e30)
        m = jnp.max(scores, axis=-1, keepdims=True)
        e = jnp.exp(scores - m) * mask                 # masked / empty rows -> 0
        denom = jnp.maximum(jnp.sum(e, axis=-1, keepdims=True), 1e-30)
        attn = e * pl.reciprocal(denom, approx=True)
        pooled = jnp.dot(attn, v_all[:, lo:hi], preferred_element_type=f32)  # [B, dkv]
        # row-block of block-diagonal w_o == this channel's output projection
        vlr_all = vlr_all + jnp.dot(pooled, wo_ref[lo:hi, :],
                                    preferred_element_type=f32)              # [B, C*H]

    # ---- 5. LeNet1 head: folded 3x3 conv (1 matmul) + ReLU + FC + log_softmax ----
    hconv = jnp.maximum(
        jnp.dot(vlr_all, w_head_ref[...], preferred_element_type=f32)
        + b_head_ref[...], 0.0)                                              # [B, c1*s*s]
    logits = jnp.dot(hconv, w_fc_ref[...],
                     preferred_element_type=f32) + b_fc_ref[...]             # [B, out]
    m = jnp.max(logits, axis=-1, keepdims=True)
    lse = jnp.log(jnp.sum(jnp.exp(logits - m), axis=-1, keepdims=True)) + m
    logp_ref[...] = logits - lse


# ------------------------- forward wrapper -------------------------

def sapnet_forward(packed, data, a_norm, batch_mask, *, cfg):
    N, in_dim = data.shape
    H = cfg["gcn_h_dim"]
    C = cfg["sz_c"]
    L = cfg["gcn_nums"]
    d_kv = cfg["d_kv"]
    out_dim = cfg["out_dim"]
    s = cfg["img_size"]
    c1 = cfg["c1"]
    B = batch_mask.shape[0]
    CH, CD, hsp = C * H, C * d_kv, s * s

    # Compile-time index constants (constant-folded under jit).
    ch_of = jnp.arange(CH, dtype=jnp.int32) // H
    sel_t = (jnp.arange(C, dtype=jnp.int32)[:, None] == ch_of[None, :]).astype(jnp.float32)
    lane = jnp.arange(CH, dtype=jnp.int32) % H
    diag_mask = (lane[:, None] == lane[None, :]).astype(jnp.float32)

    in_specs = [
        _fs((N, in_dim)), _fs((N, N)), _fs((B, N)),
        _fs((C, CH)), _fs((CH, CH)),
        _fs((in_dim, H)), _fs((1, H)), _fs((H, H)), _fs((1, H)),
        _fs((H, CH)), _fs((L - 1, CH, CH)), _fs((L, 1, CH)),
        _fs((CH, CD)), _fs((CH, CD)), _fs((CH, CD)), _fs((CD, CH)),
        _fs((CH, c1 * hsp)), _fs((1, c1 * hsp)),
        _fs((c1 * hsp, out_dim)), _fs((1, out_dim)),
    ]

    log_probs, div_loss = pl.pallas_call(
        sapnet_fused_kernel,
        out_shape=(jax.ShapeDtypeStruct((B, out_dim), jnp.float32),
                   jax.ShapeDtypeStruct((1, 1), jnp.float32)),
        in_specs=in_specs,
        out_specs=(_fs((B, out_dim)), _fs((1, 1))),
    )(data, a_norm, batch_mask, sel_t, diag_mask,
      packed["w_emb1"], packed["b_emb1"], packed["w_emb2"], packed["b_emb2"],
      packed["w_gcn0"], packed["w_gcnr"], packed["b_gcn"],
      packed["w_q"], packed["w_k"], packed["w_v"], packed["w_o"],
      packed["w_head"], packed["b_head"], packed["w_fc"], packed["b_fc"])

    return log_probs, div_loss[0, 0]


# ------------------------- host-side packing & setup -------------------------

def build_norm_adj(edge_index, num_nodes):
    a = jnp.zeros((num_nodes, num_nodes), jnp.float32)
    a = a.at[edge_index[0], edge_index[1]].set(1.0)
    a = a.at[edge_index[1], edge_index[0]].set(1.0)
    a = a + jnp.eye(num_nodes, dtype=jnp.float32)        # self loops (graph_norm)
    deg = jnp.sum(a, axis=1)
    d_inv_sqrt = 1.0 / jnp.sqrt(deg)
    return a * d_inv_sqrt[:, None] * d_inv_sqrt[None, :]


def build_shift_mats_t(s):
    # T_t^T for the 9 taps of a 3x3 "same" conv on an s x s grid: [9, s*s, s*s].
    hsp = s * s
    taps = []
    for kh in range(3):
        for kw in range(3):
            dy, dx = kh - 1, kw - 1
            m = [[0.0] * hsp for _ in range(hsp)]
            for y in range(s):
                for x in range(s):
                    yy, xx = y + dy, x + dx
                    if 0 <= yy < s and 0 <= xx < s:
                        m[y * s + x][yy * s + xx] = 1.0
            taps.append(m)
    t = jnp.array(taps, dtype=jnp.float32)        # [9, s*s, s*s] = T_t
    return jnp.transpose(t, (0, 2, 1))            # T_t^T


def build_conv_fold(w_conv, s):
    # Fold the fixed-weight 3x3 "same" conv into one dense [C*s*s, c1*s*s] map:
    # out[b, o*hsp + p'] = sum_{t,c,p} W_t[o,c] * T_t^T[p,p'] * img[b, c*hsp + p].
    hsp = s * s
    shift_tt = build_shift_mats_t(s)
    c1, C = w_conv.shape[0], w_conv.shape[1]
    m = jnp.zeros((C * hsp, c1 * hsp), jnp.float32)
    for kh in range(3):
        for kw in range(3):
            t = kh * 3 + kw
            m = m + jnp.kron(w_conv[:, :, kh, kw].T, shift_tt[t])
    return m


def pack_params(params, cfg):
    C, L, H = cfg["sz_c"], cfg["gcn_nums"], cfg["gcn_h_dim"]
    s, c1 = cfg["img_size"], cfg["c1"]
    hsp = s * s
    # TODO(synk): L == 1 would need a degenerate (empty) rest-stack; demo uses L >= 2.
    assert L >= 2
    w_gcn, b_gcn = params["w_gcn"], params["b_gcn"]
    return {
        "w_emb1": params["w_emb1"], "b_emb1": params["b_emb1"],
        "w_emb2": params["w_emb2"], "b_emb2": params["b_emb2"],
        # layer 0: lane-concatenated [H, C*H]; layers >=1: block-diag [C*H, C*H]
        "w_gcn0": jnp.concatenate([w_gcn[c, 0] for c in range(C)], axis=1),
        "w_gcnr": jnp.stack(
            [block_diag(*[w_gcn[c, l] for c in range(C)]) for l in range(1, L)]),
        "b_gcn": jnp.stack(
            [jnp.concatenate([b_gcn[c, l] for c in range(C)], axis=1)
             for l in range(L)]),
        # block-diagonal VLR projections
        "w_q": block_diag(*[params["w_q"][c] for c in range(C)]),
        "w_k": block_diag(*[params["w_k"][c] for c in range(C)]),
        "w_v": block_diag(*[params["w_v"][c] for c in range(C)]),
        "w_o": block_diag(*[params["w_o"][c] for c in range(C)]),
        # folded conv head
        "w_head": build_conv_fold(params["w_conv"], s),
        "b_head": jnp.repeat(params["b_conv"].reshape(-1), hsp)[None, :],
        "w_fc": params["w_fc"], "b_fc": params["b_fc"],
    }


def init_params(key, cfg):
    H, C, L = cfg["gcn_h_dim"], cfg["sz_c"], cfg["gcn_nums"]
    d_kv, out_dim = cfg["d_kv"], cfg["out_dim"]
    s, c1, in_dim = cfg["img_size"], cfg["c1"], cfg["in_dim"]
    ks = jax.random.split(key, 12)

    def w(k, shape):
        return 0.1 * jax.random.normal(k, shape, jnp.float32)

    return {
        "w_emb1": w(ks[0], (in_dim, H)), "b_emb1": w(ks[1], (1, H)),
        "w_emb2": w(ks[2], (H, H)),      "b_emb2": w(ks[3], (1, H)),
        "w_gcn":  w(ks[4], (C, L, H, H)),
        "b_gcn":  w(ks[5], (C, L, 1, H)),
        "w_q": w(ks[6], (C, H, d_kv)),
        "w_k": w(ks[7], (C, H, d_kv)),
        "w_v": w(ks[8], (C, H, d_kv)),
        "w_o": w(ks[9], (C, d_kv, H)),
        "w_conv": w(ks[10], (c1, C, 3, 3)),
        "b_conv": jnp.zeros((c1, 1), jnp.float32),
        "w_fc": w(ks[11], (c1 * s * s, out_dim)),
        "b_fc": jnp.zeros((1, out_dim), jnp.float32),
    }


if __name__ == "__main__":
    # net_params analogue: in_dim=8, h_dim=64, sz_c=4 -> gcn_h_dim=16,
    # gcn_num=2, out_dim=3, d_kv=16 (scaled down from 32), SMUFlag=False.
    cfg = dict(in_dim=8, gcn_h_dim=16, sz_c=4, gcn_nums=2,
               d_kv=16, out_dim=3, img_size=4, c1=8)
    assert cfg["img_size"] ** 2 == cfg["gcn_h_dim"]
    assert cfg["gcn_nums"] >= 2

    B = 2
    nodes_per_graph = 8
    N = B * nodes_per_graph

    key = jax.random.PRNGKey(0)
    k_data, k_par = jax.random.split(key)

    data = jax.random.normal(k_data, (N, cfg["in_dim"]), jnp.float32)

    # deterministic ring graph for each of the B graphs
    src, dst = [], []
    for g in range(B):
        base = g * nodes_per_graph
        for i in range(nodes_per_graph):
            src.append(base + i)
            dst.append(base + (i + 1) % nodes_per_graph)
    edge_index = jnp.array([src, dst], dtype=jnp.int32)
    batch = jnp.repeat(jnp.arange(B, dtype=jnp.int32), nodes_per_graph)

    a_norm = build_norm_adj(edge_index, N)
    batch_mask = (batch[None, :] ==
                  jnp.arange(B, dtype=jnp.int32)[:, None]).astype(jnp.float32)

    params = init_params(k_par, cfg)
    packed = pack_params(params, cfg)     # one-time host-side weight packing

    fwd = jax.jit(functools.partial(sapnet_forward, cfg=cfg))
    log_probs, div_loss = fwd(packed, data, a_norm, batch_mask)
    jax.block_until_ready((log_probs, div_loss))

    assert log_probs.shape == (B, cfg["out_dim"])
    assert bool(jnp.all(jnp.isfinite(log_probs))) and bool(jnp.isfinite(div_loss))
    print("KERNEL_OK")
</pallas_src>

<mosaic_0001>
module attributes {stable_mosaic.version = 11 : i64} {
  func.func @sapnet_fused_kernel(%arg0: memref<16x8xf32, #tpu.memory_space<vmem>>, %arg1: memref<16x16xf32, #tpu.memory_space<vmem>>, %arg2: memref<2x16xf32, #tpu.memory_space<vmem>>, %arg3: memref<4x64xf32, #tpu.memory_space<vmem>>, %arg4: memref<64x64xf32, #tpu.memory_space<vmem>>, %arg5: memref<8x16xf32, #tpu.memory_space<vmem>>, %arg6: memref<1x16xf32, #tpu.memory_space<vmem>>, %arg7: memref<16x16xf32, #tpu.memory_space<vmem>>, %arg8: memref<1x16xf32, #tpu.memory_space<vmem>>, %arg9: memref<16x64xf32, #tpu.memory_space<vmem>>, %arg10: memref<1x64x64xf32, #tpu.memory_space<vmem>>, %arg11: memref<2x1x64xf32, #tpu.memory_space<vmem>>, %arg12: memref<64x64xf32, #tpu.memory_space<vmem>>, %arg13: memref<64x64xf32, #tpu.memory_space<vmem>>, %arg14: memref<64x64xf32, #tpu.memory_space<vmem>>, %arg15: memref<64x64xf32, #tpu.memory_space<vmem>>, %arg16: memref<64x128xf32, #tpu.memory_space<vmem>>, %arg17: memref<1x128xf32, #tpu.memory_space<vmem>>, %arg18: memref<128x3xf32, #tpu.memory_space<vmem>>, %arg19: memref<1x3xf32, #tpu.memory_space<vmem>>, %arg20: memref<2x3xf32, #tpu.memory_space<vmem>>, %arg21: memref<1x1xf32, #tpu.memory_space<vmem>>) attributes {dimension_semantics = [], scalar_prefetch = 0 : i64, scratch_operands = 0 : i64, tpu.core_type = #tpu.core_type<tc>} {
    %c0 = arith.constant 0 : index
    %c0_0 = arith.constant 0 : index
    %0 = vector.load %arg0[%c0, %c0_0] : memref<16x8xf32, #tpu.memory_space<vmem>>, vector<16x8xf32>
    %c0_1 = arith.constant 0 : index
    %c0_2 = arith.constant 0 : index
    %1 = vector.load %arg5[%c0_1, %c0_2] : memref<8x16xf32, #tpu.memory_space<vmem>>, vector<8x16xf32>
    %cst = arith.constant dense<0.000000e+00> : vector<16x16xf32>
    %2 = tpu.matmul %0, %1, %cst {dimension_numbers = #tpu.dot_dimension_numbers<[1], [0], [0], [1], [0, 0, 1, 1], [], []>} : vector<16x8xf32>, vector<8x16xf32>, vector<16x16xf32> -> vector<16x16xf32>
    %c0_3 = arith.constant 0 : index
    %c0_4 = arith.constant 0 : index
    %3 = vector.load %arg6[%c0_3, %c0_4] : memref<1x16xf32, #tpu.memory_space<vmem>>, vector<1x16xf32>
    %4 = vector.broadcast %3 : vector<1x16xf32> to vector<16x16xf32>
    %5 = arith.addf %2, %4 : vector<16x16xf32>
    %c0_5 = arith.constant 0 : index
    %c0_6 = arith.constant 0 : index
    %6 = vector.load %arg7[%c0_5, %c0_6] : memref<16x16xf32, #tpu.memory_space<vmem>>, vector<16x16xf32>
    %cst_7 = arith.constant dense<0.000000e+00> : vector<16x16xf32>
    %7 = tpu.matmul %5, %6, %cst_7 {dimension_numbers = #tpu.dot_dimension_numbers<[1], [0], [0], [1], [0, 0, 1, 1], [], []>} : vector<16x16xf32>, vector<16x16xf32>, vector<16x16xf32> -> vector<16x16xf32>
    %c0_8 = arith.constant 0 : index
    %c0_9 = arith.constant 0 : index
    %8 = vector.load %arg8[%c0_8, %c0_9] : memref<1x16xf32, #tpu.memory_space<vmem>>, vector<1x16xf32>
    %9 = vector.broadcast %8 : vector<1x16xf32> to vector<16x16xf32>
    %10 = arith.addf %7, %9 : vector<16x16xf32>
    %c0_10 = arith.constant 0 : index
    %c0_11 = arith.constant 0 : index
    %11 = vector.load %arg1[%c0_10, %c0_11] : memref<16x16xf32, #tpu.memory_space<vmem>>, vector<16x16xf32>
    %c0_12 = arith.constant 0 : index
    %c0_13 = arith.constant 0 : index
    %12 = vector.load %arg9[%c0_12, %c0_13] : memref<16x64xf32, #tpu.memory_space<vmem>>, vector<16x64xf32>
    %cst_14 = arith.constant dense<0.000000e+00> : vector<16x64xf32>
    %13 = tpu.matmul %10, %12, %cst_14 {dimension_numbers = #tpu.dot_dimension_numbers<[1], [0], [0], [1], [0, 0, 1, 1], [], []>} : vector<16x16xf32>, vector<16x64xf32>, vector<16x64xf32> -> vector<16x64xf32>
    %cst_15 = arith.constant dense<0.000000e+00> : vector<16x64xf32>
    %14 = tpu.matmul %11, %13, %cst_15 {dimension_numbers = #tpu.dot_dimension_numbers<[1], [0], [0], [1], [0, 0, 1, 1], [], []>} : vector<16x16xf32>, vector<16x64xf32>, vector<16x64xf32> -> vector<16x64xf32>
    %c0_16 = arith.constant 0 : index
    %c0_17 = arith.constant 0 : index
    %c0_18 = arith.constant 0 : index
    %15 = vector.load %arg11[%c0_16, %c0_17, %c0_18] : memref<2x1x64xf32, #tpu.memory_space<vmem>>, vector<1x1x64xf32>
    %16 = vector.shape_cast %15 : vector<1x1x64xf32> to vector<1x64xf32>
    %17 = vector.broadcast %16 : vector<1x64xf32> to vector<16x64xf32>
    %18 = arith.addf %14, %17 : vector<16x64xf32>
    %cst_19 = arith.constant 0.000000e+00 : f32
    %19 = vector.broadcast %cst_19 : f32 to vector<16x64xf32>
    %20 = arith.maximumf %18, %19 : vector<16x64xf32>
    %c0_20 = arith.constant 0 : index
    %c0_21 = arith.constant 0 : index
    %c0_22 = arith.constant 0 : index
    %21 = vector.load %arg10[%c0_20, %c0_21, %c0_22] : memref<1x64x64xf32, #tpu.memory_space<vmem>>, vector<1x64x64xf32>
    %22 = vector.shape_cast %21 : vector<1x64x64xf32> to vector<64x64xf32>
    %cst_23 = arith.constant dense<0.000000e+00> : vector<16x64xf32>
    %23 = tpu.matmul %20, %22, %cst_23 {dimension_numbers = #tpu.dot_dimension_numbers<[1], [0], [0], [1], [0, 0, 1, 1], [], []>} : vector<16x64xf32>, vector<64x64xf32>, vector<16x64xf32> -> vector<16x64xf32>
    %cst_24 = arith.constant dense<0.000000e+00> : vector<16x64xf32>
    %24 = tpu.matmul %11, %23, %cst_24 {dimension_numbers = #tpu.dot_dimension_numbers<[1], [0], [0], [1], [0, 0, 1, 1], [], []>} : vector<16x16xf32>, vector<16x64xf32>, vector<16x64xf32> -> vector<16x64xf32>
    %c1 = arith.constant 1 : index
    %c0_25 = arith.constant 0 : index
    %c0_26 = arith.constant 0 : index
    %25 = vector.load %arg11[%c1, %c0_25, %c0_26] : memref<2x1x64xf32, #tpu.memory_space<vmem>>, vector<1x1x64xf32>
    %26 = vector.shape_cast %25 : vector<1x1x64xf32> to vector<1x64xf32>
    %27 = vector.broadcast %26 : vector<1x64xf32> to vector<16x64xf32>
    %28 = arith.addf %24, %27 : vector<16x64xf32>
    %cst_27 = arith.constant 0.000000e+00 : f32
    %29 = vector.broadcast %cst_27 : f32 to vector<16x64xf32>
    %30 = arith.maximumf %28, %29 : vector<16x64xf32>
    %c0_28 = arith.constant 0 : index
    %c0_29 = arith.constant 0 : index
    %31 = vector.load %arg3[%c0_28, %c0_29] : memref<4x64xf32, #tpu.memory_space<vmem>>, vector<4x64xf32>
    %cst_30 = arith.constant dense<0.000000e+00> : vector<64xf32>
    %32 = vector.multi_reduction <add>, %30, %cst_30 [0] : vector<16x64xf32> to vector<64xf32>
    %33 = vector.shape_cast %32 : vector<64xf32> to vector<1x64xf32>
    %cst_31 = arith.constant dense<0.000000e+00> : vector<1x4xf32>
    %34 = tpu.matmul %33, %31, %cst_31 {dimension_numbers = #tpu.dot_dimension_numbers<[1], [1], [0], [0], [0, 0, 1, 0], [], []>} : vector<1x64xf32>, vector<4x64xf32>, vector<1x4xf32> -> vector<1x4xf32>
    %cst_32 = arith.constant 3.906250e-03 : f32
    %35 = vector.broadcast %cst_32 : f32 to vector<1x4xf32>
    %36 = arith.mulf %34, %35 : vector<1x4xf32>
    %cst_33 = arith.constant dense<0.000000e+00> : vector<1x64xf32>
    %37 = tpu.matmul %36, %31, %cst_33 {dimension_numbers = #tpu.dot_dimension_numbers<[1], [0], [0], [1], [0, 0, 1, 1], [], []>} : vector<1x4xf32>, vector<4x64xf32>, vector<1x64xf32> -> vector<1x64xf32>
    %38 = vector.broadcast %37 : vector<1x64xf32> to vector<16x64xf32>
    %39 = arith.subf %30, %38 : vector<16x64xf32>
    %cst_34 = arith.constant dense<0.000000e+00> : vector<64x64xf32>
    %40 = tpu.matmul %39, %39, %cst_34 {dimension_numbers = #tpu.dot_dimension_numbers<[0], [0], [1], [1], [0, 1, 1, 1], [], []>} : vector<16x64xf32>, vector<16x64xf32>, vector<64x64xf32> -> vector<64x64xf32>
    %c0_35 = arith.constant 0 : index
    %c0_36 = arith.constant 0 : index
    %41 = vector.load %arg4[%c0_35, %c0_36] : memref<64x64xf32, #tpu.memory_space<vmem>>, vector<64x64xf32>
    %42 = arith.mulf %40, %41 : vector<64x64xf32>
    %cst_37 = arith.constant dense<0.000000e+00> : vector<4x64xf32>
    %43 = tpu.matmul %31, %42, %cst_37 {dimension_numbers = #tpu.dot_dimension_numbers<[1], [0], [0], [1], [0, 0, 1, 1], [], []>} : vector<4x64xf32>, vector<64x64xf32>, vector<4x64xf32> -> vector<4x64xf32>
    %cst_38 = arith.constant dense<0.000000e+00> : vector<4x4xf32>
    %44 = tpu.matmul %43, %31, %cst_38 {dimension_numbers = #tpu.dot_dimension_numbers<[1], [1], [0], [0], [0, 0, 1, 0], [], []>} : vector<4x64xf32>, vector<4x64xf32>, vector<4x4xf32> -> vector<4x4xf32>
    %45 = tpu.iota {dimensions = array<i32: 0>} : vector<4x4xi32>
    %46 = tpu.iota {dimensions = array<i32: 1>} : vector<4x4xi32>
    %47 = arith.cmpi eq, %45, %46 : vector<4x4xi32>
    %48 = arith.extui %47 : vector<4x4xi1> to vector<4x4xi32>
    %49 = arith.sitofp %48 : vector<4x4xi32> to vector<4x4xf32>
    %50 = arith.mulf %44, %49 : vector<4x4xf32>
    %cst_39 = arith.constant dense<0.000000e+00> : vector<4xf32>
    %51 = vector.multi_reduction <add>, %50, %cst_39 [1] : vector<4x4xf32> to vector<4xf32>
    %52 = vector.shape_cast %51 : vector<4xf32> to vector<4x1xf32>
    %cst_40 = arith.constant 9.99999996E-13 : f32
    %53 = vector.broadcast %cst_40 : f32 to vector<4x1xf32>
    %54 = arith.addf %52, %53 : vector<4x1xf32>
    %cst_41 = arith.constant dense<0.000000e+00> : vector<4xf32>
    %55 = vector.multi_reduction <add>, %50, %cst_41 [0] : vector<4x4xf32> to vector<4xf32>
    %56 = vector.shape_cast %55 : vector<4xf32> to vector<1x4xf32>
    %cst_42 = arith.constant 9.99999996E-13 : f32
    %57 = vector.broadcast %cst_42 : f32 to vector<1x4xf32>
    %58 = arith.addf %56, %57 : vector<1x4xf32>
    %59 = vector.broadcast %54 : vector<4x1xf32> to vector<4x4xf32>
    %60 = vector.broadcast %58 : vector<1x4xf32> to vector<4x4xf32>
    %61 = arith.mulf %59, %60 : vector<4x4xf32>
    %62 = math.rsqrt %61 : vector<4x4xf32>
    %63 = arith.mulf %44, %62 : vector<4x4xf32>
    %64 = math.absf %63 : vector<4x4xf32>
    %cst_43 = arith.constant 1.000000e+00 : f32
    %65 = vector.broadcast %cst_43 : f32 to vector<4x4xf32>
    %66 = arith.subf %65, %49 : vector<4x4xf32>
    %67 = arith.mulf %64, %66 : vector<4x4xf32>
    %cst_44 = arith.constant dense<0.000000e+00> : vector<4xf32>
    %68 = vector.multi_reduction <add>, %67, %cst_44 [1] : vector<4x4xf32> to vector<4xf32>
    %69 = vector.shape_cast %68 : vector<4xf32> to vector<4x1xf32>
    %cst_45 = arith.constant dense<0.000000e+00> : vector<1xf32>
    %70 = vector.multi_reduction <add>, %69, %cst_45 [0] : vector<4x1xf32> to vector<1xf32>
    %71 = vector.shape_cast %70 : vector<1xf32> to vector<1x1xf32>
    %cst_46 = arith.constant 0.0833333358 : f32
    %72 = vector.broadcast %cst_46 : f32 to vector<1x1xf32>
    %73 = arith.mulf %71, %72 : vector<1x1xf32>
    %c0_47 = arith.constant 0 : index
    %c0_48 = arith.constant 0 : index
    %74 = vector.load %arg21[%c0_47, %c0_48] : memref<1x1xf32, #tpu.memory_space<vmem>>, vector<1x1xf32>
    tpu.vector_store %arg21[%c0_47, %c0_48], %73 {strides = array<i32>} : memref<1x1xf32, #tpu.memory_space<vmem>>, vector<1x1xf32>,
    %c0_49 = arith.constant 0 : index
    %c0_50 = arith.constant 0 : index
    %75 = vector.load %arg2[%c0_49, %c0_50] : memref<2x16xf32, #tpu.memory_space<vmem>>, vector<2x16xf32>
    %cst_51 = arith.constant dense<0.000000e+00> : vector<2xf32>
    %76 = vector.multi_reduction <add>, %75, %cst_51 [1] : vector<2x16xf32> to vector<2xf32>
    %77 = vector.shape_cast %76 : vector<2xf32> to vector<2x1xf32>
    %cst_52 = arith.constant 1.000000e+00 : f32
    %78 = vector.broadcast %cst_52 : f32 to vector<2x1xf32>
    %79 = arith.maximumf %77, %78 : vector<2x1xf32>
    %80 = tpu.reciprocal %79 {approx = true} : vector<2x1xf32> -> vector<2x1xf32>
    %c0_53 = arith.constant 0 : index
    %c0_54 = arith.constant 0 : index
    %81 = vector.load %arg13[%c0_53, %c0_54] : memref<64x64xf32, #tpu.memory_space<vmem>>, vector<64x64xf32>
    %cst_55 = arith.constant dense<0.000000e+00> : vector<16x64xf32>
    %82 = tpu.matmul %30, %81, %cst_55 {dimension_numbers = #tpu.dot_dimension_numbers<[1], [0], [0], [1], [0, 0, 1, 1], [], []>} : vector<16x64xf32>, vector<64x64xf32>, vector<16x64xf32> -> vector<16x64xf32>
    %c0_56 = arith.constant 0 : index
    %c0_57 = arith.constant 0 : index
    %83 = vector.load %arg14[%c0_56, %c0_57] : memref<64x64xf32, #tpu.memory_space<vmem>>, vector<64x64xf32>
    %cst_58 = arith.constant dense<0.000000e+00> : vector<16x64xf32>
    %84 = tpu.matmul %30, %83, %cst_58 {dimension_numbers = #tpu.dot_dimension_numbers<[1], [0], [0], [1], [0, 0, 1, 1], [], []>} : vector<16x64xf32>, vector<64x64xf32>, vector<16x64xf32> -> vector<16x64xf32>
    %cst_59 = arith.constant dense<0.000000e+00> : vector<2x64xf32>
    %85 = tpu.matmul %75, %30, %cst_59 {dimension_numbers = #tpu.dot_dimension_numbers<[1], [0], [0], [1], [0, 0, 1, 1], [], []>} : vector<2x16xf32>, vector<16x64xf32>, vector<2x64xf32> -> vector<2x64xf32>
    %86 = vector.broadcast %80 : vector<2x1xf32> to vector<2x64xf32>
    %87 = arith.mulf %85, %86 : vector<2x64xf32>
    %c0_60 = arith.constant 0 : index
    %c0_61 = arith.constant 0 : index
    %88 = vector.load %arg12[%c0_60, %c0_61] : memref<64x64xf32, #tpu.memory_space<vmem>>, vector<64x64xf32>
    %cst_62 = arith.constant dense<0.000000e+00> : vector<2x64xf32>
    %89 = tpu.matmul %87, %88, %cst_62 {dimension_numbers = #tpu.dot_dimension_numbers<[1], [0], [0], [1], [0, 0, 1, 1], [], []>} : vector<2x64xf32>, vector<64x64xf32>, vector<2x64xf32> -> vector<2x64xf32>
    %cst_63 = arith.constant 2.500000e-01 : f32
    %90 = vector.broadcast %cst_63 : f32 to vector<2x64xf32>
    %91 = arith.mulf %89, %90 : vector<2x64xf32>
    %cst_64 = arith.constant 0.000000e+00 : f32
    %92 = vector.broadcast %cst_64 : f32 to vector<2x64xf32>
    %93 = vector.extract_strided_slice %91 {offsets = [0, 0], sizes = [2, 16], strides = [1, 1]} : vector<2x64xf32> to vector<2x16xf32>
    %94 = vector.extract_strided_slice %82 {offsets = [0, 0], sizes = [16, 16], strides = [1, 1]} : vector<16x64xf32> to vector<16x16xf32>
    %cst_65 = arith.constant dense<0.000000e+00> : vector<2x16xf32>
    %95 = tpu.matmul %93, %94, %cst_65 {dimension_numbers = #tpu.dot_dimension_numbers<[1], [1], [0], [0], [0, 0, 1, 0], [], []>} : vector<2x16xf32>, vector<16x16xf32>, vector<2x16xf32> -> vector<2x16xf32>
    %cst_66 = arith.constant 0.000000e+00 : f32
    %96 = vector.broadcast %cst_66 : f32 to vector<2x16xf32>
    %97 = arith.cmpf ogt, %75, %96 : vector<2x16xf32>
    %cst_67 = arith.constant -1.000000e+30 : f32
    %98 = vector.broadcast %cst_67 : f32 to vector<2x16xf32>
    %99 = arith.select %97, %95, %98 : vector<2x16xi1>, vector<2x16xf32>
    %cst_68 = arith.constant dense<0xFF800000> : vector<2xf32>
    %100 = vector.multi_reduction <maximumf>, %99, %cst_68 [1] : vector<2x16xf32> to vector<2xf32>
    %101 = vector.shape_cast %100 : vector<2xf32> to vector<2x1xf32>
    %102 = vector.broadcast %101 : vector<2x1xf32> to vector<2x16xf32>
    %103 = arith.subf %99, %102 : vector<2x16xf32>
    %104 = math.exp %103 : vector<2x16xf32>
    %105 = arith.mulf %104, %75 : vector<2x16xf32>
    %cst_69 = arith.constant dense<0.000000e+00> : vector<2xf32>
    %106 = vector.multi_reduction <add>, %105, %cst_69 [1] : vector<2x16xf32> to vector<2xf32>
    %107 = vector.shape_cast %106 : vector<2xf32> to vector<2x1xf32>
    %cst_70 = arith.constant 1.000000e-30 : f32
    %108 = vector.broadcast %cst_70 : f32 to vector<2x1xf32>
    %109 = arith.maximumf %107, %108 : vector<2x1xf32>
    %110 = tpu.reciprocal %109 {approx = true} : vector<2x1xf32> -> vector<2x1xf32>
    %111 = vector.broadcast %110 : vector<2x1xf32> to vector<2x16xf32>
    %112 = arith.mulf %105, %111 : vector<2x16xf32>
    %113 = vector.extract_strided_slice %84 {offsets = [0, 0], sizes = [16, 16], strides = [1, 1]} : vector<16x64xf32> to vector<16x16xf32>
    %cst_71 = arith.constant dense<0.000000e+00> : vector<2x16xf32>
    %114 = tpu.matmul %112, %113, %cst_71 {dimension_numbers = #tpu.dot_dimension_numbers<[1], [0], [0], [1], [0, 0, 1, 1], [], []>} : vector<2x16xf32>, vector<16x16xf32>, vector<2x16xf32> -> vector<2x16xf32>
    %c0_72 = arith.constant 0 : index
    %c0_73 = arith.constant 0 : index
    %115 = vector.load %arg15[%c0_72, %c0_73] : memref<64x64xf32, #tpu.memory_space<vmem>>, vector<16x64xf32>
    %cst_74 = arith.constant dense<0.000000e+00> : vector<2x64xf32>
    %116 = tpu.matmul %114, %115, %cst_74 {dimension_numbers = #tpu.dot_dimension_numbers<[1], [0], [0], [1], [0, 0, 1, 1], [], []>} : vector<2x16xf32>, vector<16x64xf32>, vector<2x64xf32> -> vector<2x64xf32>
    %117 = arith.addf %92, %116 : vector<2x64xf32>
    %118 = vector.extract_strided_slice %91 {offsets = [0, 16], sizes = [2, 16], strides = [1, 1]} : vector<2x64xf32> to vector<2x16xf32>
    %119 = vector.extract_strided_slice %82 {offsets = [0, 16], sizes = [16, 16], strides = [1, 1]} : vector<16x64xf32> to vector<16x16xf32>
    %cst_75 = arith.constant dense<0.000000e+00> : vector<2x16xf32>
    %120 = tpu.matmul %118, %119, %cst_75 {dimension_numbers = #tpu.dot_dimension_numbers<[1], [1], [0], [0], [0, 0, 1, 0], [], []>} : vector<2x16xf32>, vector<16x16xf32>, vector<2x16xf32> -> vector<2x16xf32>
    %cst_76 = arith.constant 0.000000e+00 : f32
    %121 = vector.broadcast %cst_76 : f32 to vector<2x16xf32>
    %122 = arith.cmpf ogt, %75, %121 : vector<2x16xf32>
    %cst_77 = arith.constant -1.000000e+30 : f32
    %123 = vector.broadcast %cst_77 : f32 to vector<2x16xf32>
    %124 = arith.select %122, %120, %123 : vector<2x16xi1>, vector<2x16xf32>
    %cst_78 = arith.constant dense<0xFF800000> : vector<2xf32>
    %125 = vector.multi_reduction <maximumf>, %124, %cst_78 [1] : vector<2x16xf32> to vector<2xf32>
    %126 = vector.shape_cast %125 : vector<2xf32> to vector<2x1xf32>
    %127 = vector.broadcast %126 : vector<2x1xf32> to vector<2x16xf32>
    %128 = arith.subf %124, %127 : vector<2x16xf32>
    %129 = math.exp %128 : vector<2x16xf32>
    %130 = arith.mulf %129, %75 : vector<2x16xf32>
    %cst_79 = arith.constant dense<0.000000e+00> : vector<2xf32>
    %131 = vector.multi_reduction <add>, %130, %cst_79 [1] : vector<2x16xf32> to vector<2xf32>
    %132 = vector.shape_cast %131 : vector<2xf32> to vector<2x1xf32>
    %cst_80 = arith.constant 1.000000e-30 : f32
    %133 = vector.broadcast %cst_80 : f32 to vector<2x1xf32>
    %134 = arith.maximumf %132, %133 : vector<2x1xf32>
    %135 = tpu.reciprocal %134 {approx = true} : vector<2x1xf32> -> vector<2x1xf32>
    %136 = vector.broadcast %135 : vector<2x1xf32> to vector<2x16xf32>
    %137 = arith.mulf %130, %136 : vector<2x16xf32>
    %138 = vector.extract_strided_slice %84 {offsets = [0, 16], sizes = [16, 16], strides = [1, 1]} : vector<16x64xf32> to vector<16x16xf32>
    %cst_81 = arith.constant dense<0.000000e+00> : vector<2x16xf32>
    %139 = tpu.matmul %137, %138, %cst_81 {dimension_numbers = #tpu.dot_dimension_numbers<[1], [0], [0], [1], [0, 0, 1, 1], [], []>} : vector<2x16xf32>, vector<16x16xf32>, vector<2x16xf32> -> vector<2x16xf32>
    %c16 = arith.constant 16 : index
    %c0_82 = arith.constant 0 : index
    %140 = vector.load %arg15[%c16, %c0_82] : memref<64x64xf32, #tpu.memory_space<vmem>>, vector<16x64xf32>
    %cst_83 = arith.constant dense<0.000000e+00> : vector<2x64xf32>
    %141 = tpu.matmul %139, %140, %cst_83 {dimension_numbers = #tpu.dot_dimension_numbers<[1], [0], [0], [1], [0, 0, 1, 1], [], []>} : vector<2x16xf32>, vector<16x64xf32>, vector<2x64xf32> -> vector<2x64xf32>
    %142 = arith.addf %117, %141 : vector<2x64xf32>
    %143 = vector.extract_strided_slice %91 {offsets = [0, 32], sizes = [2, 16], strides = [1, 1]} : vector<2x64xf32> to vector<2x16xf32>
    %144 = vector.extract_strided_slice %82 {offsets = [0, 32], sizes = [16, 16], strides = [1, 1]} : vector<16x64xf32> to vector<16x16xf32>
    %cst_84 = arith.constant dense<0.000000e+00> : vector<2x16xf32>
    %145 = tpu.matmul %143, %144, %cst_84 {dimension_numbers = #tpu.dot_dimension_numbers<[1], [1], [0], [0], [0, 0, 1, 0], [], []>} : vector<2x16xf32>, vector<16x16xf32>, vector<2x16xf32> -> vector<2x16xf32>
    %cst_85 = arith.constant 0.000000e+00 : f32
    %146 = vector.broadcast %cst_85 : f32 to vector<2x16xf32>
    %147 = arith.cmpf ogt, %75, %146 : vector<2x16xf32>
    %cst_86 = arith.constant -1.000000e+30 : f32
    %148 = vector.broadcast %cst_86 : f32 to vector<2x16xf32>
    %149 = arith.select %147, %145, %148 : vector<2x16xi1>, vector<2x16xf32>
    %cst_87 = arith.constant dense<0xFF800000> : vector<2xf32>
    %150 = vector.multi_reduction <maximumf>, %149, %cst_87 [1] : vector<2x16xf32> to vector<2xf32>
    %151 = vector.shape_cast %150 : vector<2xf32> to vector<2x1xf32>
    %152 = vector.broadcast %151 : vector<2x1xf32> to vector<2x16xf32>
    %153 = arith.subf %149, %152 : vector<2x16xf32>
    %154 = math.exp %153 : vector<2x16xf32>
    %155 = arith.mulf %154, %75 : vector<2x16xf32>
    %cst_88 = arith.constant dense<0.000000e+00> : vector<2xf32>
    %156 = vector.multi_reduction <add>, %155, %cst_88 [1] : vector<2x16xf32> to vector<2xf32>
    %157 = vector.shape_cast %156 : vector<2xf32> to vector<2x1xf32>
    %cst_89 = arith.constant 1.000000e-30 : f32
    %158 = vector.broadcast %cst_89 : f32 to vector<2x1xf32>
    %159 = arith.maximumf %157, %158 : vector<2x1xf32>
    %160 = tpu.reciprocal %159 {approx = true} : vector<2x1xf32> -> vector<2x1xf32>
    %161 = vector.broadcast %160 : vector<2x1xf32> to vector<2x16xf32>
    %162 = arith.mulf %155, %161 : vector<2x16xf32>
    %163 = vector.extract_strided_slice %84 {offsets = [0, 32], sizes = [16, 16], strides = [1, 1]} : vector<16x64xf32> to vector<16x16xf32>
    %cst_90 = arith.constant dense<0.000000e+00> : vector<2x16xf32>
    %164 = tpu.matmul %162, %163, %cst_90 {dimension_numbers = #tpu.dot_dimension_numbers<[1], [0], [0], [1], [0, 0, 1, 1], [], []>} : vector<2x16xf32>, vector<16x16xf32>, vector<2x16xf32> -> vector<2x16xf32>
    %c32 = arith.constant 32 : index
    %c0_91 = arith.constant 0 : index
    %165 = vector.load %arg15[%c32, %c0_91] : memref<64x64xf32, #tpu.memory_space<vmem>>, vector<16x64xf32>
    %cst_92 = arith.constant dense<0.000000e+00> : vector<2x64xf32>
    %166 = tpu.matmul %164, %165, %cst_92 {dimension_numbers = #tpu.dot_dimension_numbers<[1], [0], [0], [1], [0, 0, 1, 1], [], []>} : vector<2x16xf32>, vector<16x64xf32>, vector<2x64xf32> -> vector<2x64xf32>
    %167 = arith.addf %142, %166 : vector<2x64xf32>
    %168 = vector.extract_strided_slice %91 {offsets = [0, 48], sizes = [2, 16], strides = [1, 1]} : vector<2x64xf32> to vector<2x16xf32>
    %169 = vector.extract_strided_slice %82 {offsets = [0, 48], sizes = [16, 16], strides = [1, 1]} : vector<16x64xf32> to vector<16x16xf32>
    %cst_93 = arith.constant dense<0.000000e+00> : vector<2x16xf32>
    %170 = tpu.matmul %168, %169, %cst_93 {dimension_numbers = #tpu.dot_dimension_numbers<[1], [1], [0], [0], [0, 0, 1, 0], [], []>} : vector<2x16xf32>, vector<16x16xf32>, vector<2x16xf32> -> vector<2x16xf32>
    %cst_94 = arith.constant 0.000000e+00 : f32
    %171 = vector.broadcast %cst_94 : f32 to vector<2x16xf32>
    %172 = arith.cmpf ogt, %75, %171 : vector<2x16xf32>
    %cst_95 = arith.constant -1.000000e+30 : f32
    %173 = vector.broadcast %cst_95 : f32 to vector<2x16xf32>
    %174 = arith.select %172, %170, %173 : vector<2x16xi1>, vector<2x16xf32>
    %cst_96 = arith.constant dense<0xFF800000> : vector<2xf32>
    %175 = vector.multi_reduction <maximumf>, %174, %cst_96 [1] : vector<2x16xf32> to vector<2xf32>
    %176 = vector.shape_cast %175 : vector<2xf32> to vector<2x1xf32>
    %177 = vector.broadcast %176 : vector<2x1xf32> to vector<2x16xf32>
    %178 = arith.subf %174, %177 : vector<2x16xf32>
    %179 = math.exp %178 : vector<2x16xf32>
    %180 = arith.mulf %179, %75 : vector<2x16xf32>
    %cst_97 = arith.constant dense<0.000000e+00> : vector<2xf32>
    %181 = vector.multi_reduction <add>, %180, %cst_97 [1] : vector<2x16xf32> to vector<2xf32>
    %182 = vector.shape_cast %181 : vector<2xf32> to vector<2x1xf32>
    %cst_98 = arith.constant 1.000000e-30 : f32
    %183 = vector.broadcast %cst_98 : f32 to vector<2x1xf32>
    %184 = arith.maximumf %182, %183 : vector<2x1xf32>
    %185 = tpu.reciprocal %184 {approx = true} : vector<2x1xf32> -> vector<2x1xf32>
    %186 = vector.broadcast %185 : vector<2x1xf32> to vector<2x16xf32>
    %187 = arith.mulf %180, %186 : vector<2x16xf32>
    %188 = vector.extract_strided_slice %84 {offsets = [0, 48], sizes = [16, 16], strides = [1, 1]} : vector<16x64xf32> to vector<16x16xf32>
    %cst_99 = arith.constant dense<0.000000e+00> : vector<2x16xf32>
    %189 = tpu.matmul %187, %188, %cst_99 {dimension_numbers = #tpu.dot_dimension_numbers<[1], [0], [0], [1], [0, 0, 1, 1], [], []>} : vector<2x16xf32>, vector<16x16xf32>, vector<2x16xf32> -> vector<2x16xf32>
    %c48 = arith.constant 48 : index
    %c0_100 = arith.constant 0 : index
    %190 = vector.load %arg15[%c48, %c0_100] : memref<64x64xf32, #tpu.memory_space<vmem>>, vector<16x64xf32>
    %cst_101 = arith.constant dense<0.000000e+00> : vector<2x64xf32>
    %191 = tpu.matmul %189, %190, %cst_101 {dimension_numbers = #tpu.dot_dimension_numbers<[1], [0], [0], [1], [0, 0, 1, 1], [], []>} : vector<2x16xf32>, vector<16x64xf32>, vector<2x64xf32> -> vector<2x64xf32>
    %192 = arith.addf %167, %191 : vector<2x64xf32>
    %c0_102 = arith.constant 0 : index
    %c0_103 = arith.constant 0 : index
    %193 = vector.load %arg16[%c0_102, %c0_103] : memref<64x128xf32, #tpu.memory_space<vmem>>, vector<64x128xf32>
    %cst_104 = arith.constant dense<0.000000e+00> : vector<2x128xf32>
    %194 = tpu.matmul %192, %193, %cst_104 {dimension_numbers = #tpu.dot_dimension_numbers<[1], [0], [0], [1], [0, 0, 1, 1], [], []>} : vector<2x64xf32>, vector<64x128xf32>, vector<2x128xf32> -> vector<2x128xf32>
    %c0_105 = arith.constant 0 : index
    %c0_106 = arith.constant 0 : index
    %195 = vector.load %arg17[%c0_105, %c0_106] : memref<1x128xf32, #tpu.memory_space<vmem>>, vector<1x128xf32>
    %196 = vector.broadcast %195 : vector<1x128xf32> to vector<2x128xf32>
    %197 = arith.addf %194, %196 : vector<2x128xf32>
    %cst_107 = arith.constant 0.000000e+00 : f32
    %198 = vector.broadcast %cst_107 : f32 to vector<2x128xf32>
    %199 = arith.maximumf %197, %198 : vector<2x128xf32>
    %c0_108 = arith.constant 0 : index
    %c0_109 = arith.constant 0 : index
    %200 = vector.load %arg18[%c0_108, %c0_109] : memref<128x3xf32, #tpu.memory_space<vmem>>, vector<128x3xf32>
    %cst_110 = arith.constant dense<0.000000e+00> : vector<2x3xf32>
    %201 = tpu.matmul %199, %200, %cst_110 {dimension_numbers = #tpu.dot_dimension_numbers<[1], [0], [0], [1], [0, 0, 1, 1], [], []>} : vector<2x128xf32>, vector<128x3xf32>, vector<2x3xf32> -> vector<2x3xf32>
    %c0_111 = arith.constant 0 : index
    %c0_112 = arith.constant 0 : index
    %202 = vector.load %arg19[%c0_111, %c0_112] : memref<1x3xf32, #tpu.memory_space<vmem>>, vector<1x3xf32>
    %203 = vector.broadcast %202 : vector<1x3xf32> to vector<2x3xf32>
    %204 = arith.addf %201, %203 : vector<2x3xf32>
    %cst_113 = arith.constant dense<0xFF800000> : vector<2xf32>
    %205 = vector.multi_reduction <maximumf>, %204, %cst_113 [1] : vector<2x3xf32> to vector<2xf32>
    %206 = vector.shape_cast %205 : vector<2xf32> to vector<2x1xf32>
    %207 = vector.broadcast %206 : vector<2x1xf32> to vector<2x3xf32>
    %208 = arith.subf %204, %207 : vector<2x3xf32>
    %209 = math.exp %208 : vector<2x3xf32>
    %cst_114 = arith.constant dense<0.000000e+00> : vector<2xf32>
    %210 = vector.multi_reduction <add>, %209, %cst_114 [1] : vector<2x3xf32> to vector<2xf32>
    %211 = vector.shape_cast %210 : vector<2xf32> to vector<2x1xf32>
    %212 = math.log %211 : vector<2x1xf32>
    %213 = arith.addf %212, %206 : vector<2x1xf32>
    %214 = vector.broadcast %213 : vector<2x1xf32> to vector<2x3xf32>
    %215 = arith.subf %204, %214 : vector<2x3xf32>
    %c0_115 = arith.constant 0 : index
    %c0_116 = arith.constant 0 : index
    %216 = vector.load %arg20[%c0_115, %c0_116] : memref<2x3xf32, #tpu.memory_space<vmem>>, vector<2x3xf32>
    tpu.vector_store %arg20[%c0_115, %c0_116], %215 {strides = array<i32>} : memref<2x3xf32, #tpu.memory_space<vmem>>, vector<2x3xf32>,
    return
  }
}

</mosaic_0001>

<bundles_post_ra>
// kernel: sapnet_forward.1
= control target key start
LH: loop header
LB: loop body
LE: loop exit
PB: predicated region body
PF: predicated region fallthrough
CT: control target
= control target key end

     0   :  { %s4572_s0 = inlined_call_operand.vmem [shape: f32[16,8], index: 0, kind: input, shape index: {}]   ;;  %s4573_s1 = inlined_call_operand.vmem [shape: f32[16,16], index: 1, kind: input, shape index: {}]   ;;  %s4574_s2 = inlined_call_operand.vmem [shape: f32[2,16], index: 2, kind: input, shape index: {}]   ;;  %s4575_s3 = inlined_call_operand.vmem [shape: f32[4,64], index: 3, kind: input, shape index: {}]   ;;  %s4576_s4 = inlined_call_operand.vmem [shape: f32[64,64], index: 4, kind: input, shape index: {}]   ;;  %s4577_s5 = inlined_call_operand.hbm [shape: f32[8,16], index: 5, kind: input, shape index: {}]   ;;  %s4578_s6 = inlined_call_operand.hbm [shape: f32[1,16], index: 6, kind: input, shape index: {}]   ;;  %s4579_s7 = inlined_call_operand.hbm [shape: f32[16,16], index: 7, kind: input, shape index: {}]   ;;  %s4580_s8 = inlined_call_operand.hbm [shape: f32[1,16], index: 8, kind: input, shape index: {}]   ;;  %s4581_s9 = inlined_call_operand.hbm [shape: f32[16,64], index: 9, kind: input, shape index: {}]   ;;  %s4582_s10 = inlined_call_operand.vmem [shape: f32[1,64,64], index: 10, kind: input, shape index: {}]   ;;  %s4583_s11 = inlined_call_operand.hbm [shape: f32[2,1,64], index: 11, kind: input, shape index: {}]   ;;  %s4584_s12 = inlined_call_operand.vmem [shape: f32[64,64], index: 12, kind: input, shape index: {}]   ;;  %s4585_s13 = inlined_call_operand.vmem [shape: f32[64,64], index: 13, kind: input, shape index: {}]   ;;  %s4586_s14 = inlined_call_operand.vmem [shape: f32[64,64], index: 14, kind: input, shape index: {}]   ;;  %s4587_s15 = inlined_call_operand.hbm [shape: f32[64,64], index: 15, kind: input, shape index: {}]   ;;  %s4588_s16 = inlined_call_operand.hbm [shape: f32[64,128], index: 16, kind: input, shape index: {}]   ;;  %s4589_s17 = inlined_call_operand.hbm [shape: f32[1,128], index: 17, kind: input, shape index: {}]   ;;  %s4590_s18 = inlined_call_operand.vmem [shape: f32[128,3], index: 18, kind: input, shape index: {}]   ;;  %s4591_s19 = inlined_call_operand.hbm [shape: f32[1,3], index: 19, kind: input, shape index: {}]   ;;  %s4592_s20 = inlined_call_operand.hbm [shape: f32[2,3], index: 20, kind: output, shape index: {0}]   ;;  %s4593_s21 = inlined_call_operand.hbm [shape: f32[1,1], index: 21, kind: output, shape index: {1}]  }
   0x1   :  { %4598 = sst [smem:[#allocation30_spill]] %s4572_s0 }
   0x2   :  { %4599 = sst [smem:[#allocation31_spill]] %s4573_s1 }
   0x3   :  { %4600 = sst [smem:[#allocation32_spill]] %s4574_s2 }
   0x4   :  { %4601 = sst [smem:[#allocation33_spill]] %s4575_s3 }
   0x5   :  { %4602 = sst [smem:[#allocation34_spill]] %s4576_s4 }
   0x6   :  { %4603 = sst [smem:[#allocation35_spill]] %s4577_s5 }
   0x7   :  { %27 = vsyncpa [#allocation3], 0 }
   0x8   :  { %28 = vsyncpa [#allocation6], 0 }
   0x9   :  { %29 = vsyncpa [#allocation9], 0 }
   0xa   :  { %30 = vsyncpa [#allocation12], 0 }
   0xb   :  { %31 = vsyncpa [#allocation15], 0 }
   0xc   :  { %32 = vsyncpa [#allocation18], 0 }
   0xd   :  { %33 = vsyncpa [#allocation4], 0 }
   0xe   :  { %34 = vsyncpa [#allocation21], 0  ;;  %s3865_s2 = smov [#allocation5]   ;;  %s3866_s26 = smov [#allocation8]  }
   0xf   :  { %s61_s25 = sshll.u32 %s3865_s2, 4  ;;  %s83_s27 = sshll.u32 %s3866_s26, 4  ;;  %s62_s25 = int_to_ptr.vmem [resolvable:$true] %s61_s25  ;;  %s84_s27 = int_to_ptr.vmem [resolvable:$true] %s83_s27 }
  0x10   :  { %s3585_s29 = scalar_lea.hbm %s4578_s6, 16 }
  0x11   :  { %p3586_p0 = scmp.ne.s32.totalorder %s4578_s6, %s3585_s29  ;;  %p3589_p1 = scmp.lt.u32.totalorder %s3585_s29, %s4578_s6 }
  0x13   :  { %p3591_p2 = pnand %p3589_p1, %p3586_p0 }
  0x15   :  { %3594 = shalt.err (!%p3591_p2)
}
  0x16   :  { %s3595_s22 = scalar_lea.vmem %s62_s25, 16  ;;  %s3599_s23 = scalar_lea.vmem %s62_s25, 32 }
  0x17   :  { %p3596_p3 = scmp.ne.s32.totalorder %s62_s25, %s3595_s22  ;;  %p3600_p4 = scmp.lt.s32.totalorder %s62_s25, %s62_s25 }
  0x18   :  { %p3601_p5 = scmp.lt.s32.totalorder %s3599_s23, %s3595_s22 }
  0x1a   :  { %p3602_p6 = por %p3601_p5, %p3600_p4 }
  0x1c   :  { %p3603_p7 = pnand %p3602_p6, %p3596_p3 }
  0x1e   :  { %3606 = shalt.err (!%p3603_p7)
}
  0x1f   :  { %64 = dma.hbm_to_vmem [thread:$0]  %s4578_s6, 16, %s62_s25, [#allocation6]  }
  0x20   :  { %s3607_s3 = scalar_lea.hbm %s4580_s8, 16 }
  0x21   :  { %p3608_p8 = scmp.ne.s32.totalorder %s4580_s8, %s3607_s3  ;;  %p3611_p9 = scmp.lt.u32.totalorder %s3607_s3, %s4580_s8 }
  0x23   :  { %p3613_p10 = pnand %p3611_p9, %p3608_p8 }
  0x25   :  { %3616 = shalt.err (!%p3613_p10)
}
  0x26   :  { %s3617_s30 = scalar_lea.vmem %s84_s27, 16  ;;  %s3621_s5 = scalar_lea.vmem %s84_s27, 32 }
  0x27   :  { %p3618_p11 = scmp.ne.s32.totalorder %s84_s27, %s3617_s30  ;;  %p3622_p12 = scmp.lt.s32.totalorder %s84_s27, %s84_s27 }
  0x28   :  { %p3623_p13 = scmp.lt.s32.totalorder %s3621_s5, %s3617_s30 }
  0x2a   :  { %p3624_p0 = por %p3623_p13, %p3622_p12 }
  0x2c   :  { %p3625_p1 = pnand %p3624_p0, %p3618_p11 }
  0x2e   :  { %3628 = shalt.err (!%p3625_p1)
}
  0x2f   :  { %86 = dma.hbm_to_vmem [thread:$0]  %s4580_s8, 16, %s84_s27, [#allocation9]  }
  0x30   :  { %s3867_s22 = smov [#allocation11]   ;;  %s3629_s2 = scalar_lea.hbm %s4583_s11, 32 }
  0x31   :  { %s106_s23 = sshll.u32 %s3867_s22, 4  ;;  %p3630_p2 = scmp.ne.s32.totalorder %s4583_s11, %s3629_s2  ;;  %s107_s23 = int_to_ptr.vmem [resolvable:$true] %s106_s23 }
  0x32   :  { %p3633_p3 = scmp.lt.u32.totalorder %s3629_s2, %s4583_s11 }
  0x34   :  { %p3635_p4 = pnand %p3633_p3, %p3630_p2 }
  0x36   :  { %3638 = shalt.err (!%p3635_p4)
}
  0x37   :  { %s3639_s0 = scalar_lea.vmem %s107_s23, 32  ;;  %p3644_p6 = scmp.lt.s32.totalorder %s107_s23, %s107_s23 }
  0x38   :  { %p3640_p5 = scmp.ne.s32.totalorder %s107_s23, %s3639_s0  ;;  %p3645_p7 = scmp.lt.s32.totalorder %s3639_s0, %s3639_s0 }
  0x3a   :  { %p3646_p8 = por %p3645_p7, %p3644_p6 }
  0x3c   :  { %p3647_p9 = pnand %p3646_p8, %p3640_p5 }
  0x3e   :  { %3650 = shalt.err (!%p3647_p9)
}
  0x3f   :  { %s3868_s8 = smov 16   ;;  %s3869_s27 = smov 1  }
  0x40   :  { %112 = dma.hbm_to_vmem [thread:$0]  %s4583_s11, 32, %s107_s23, [#allocation12], %s3868_s8, %s3868_s8, %s3869_s27  }
  0x41   :  { %s3870_s5 = smov [#allocation14]   ;;  %s3871_s25 = smov [#allocation2]  }
  0x42   :  { %s136_s6 = sshll.u32 %s3870_s5, 4  ;;  %s51_s22 = sshll.u32 %s3871_s25, 4  ;;  %s137_s6 = int_to_ptr.vmem [resolvable:$true] %s136_s6  ;;  %s52_s22 = int_to_ptr.vmem [resolvable:$true] %s51_s22 }
  0x43   :  { %s3651_s2 = scalar_lea.hbm %s4588_s16, 1024 }
  0x44   :  { %p3652_p10 = scmp.ne.s32.totalorder %s4588_s16, %s3651_s2  ;;  %p3655_p11 = scmp.lt.u32.totalorder %s3651_s2, %s4588_s16 }
  0x46   :  { %p3657_p12 = pnand %p3655_p11, %p3652_p10 }
  0x48   :  { %3660 = shalt.err (!%p3657_p12)
}
  0x49   :  { %s3661_s11 = scalar_lea.vmem %s137_s6, 1024  ;;  %p3666_p0 = scmp.lt.s32.totalorder %s137_s6, %s137_s6 }
  0x4a   :  { %p3662_p13 = scmp.ne.s32.totalorder %s137_s6, %s3661_s11  ;;  %p3667_p1 = scmp.lt.s32.totalorder %s3661_s11, %s3661_s11 }
  0x4c   :  { %p3668_p2 = por %p3667_p1, %p3666_p0 }
  0x4e   :  { %p3669_p3 = pnand %p3668_p2, %p3662_p13 }
  0x50   :  { %3672 = shalt.err (!%p3669_p3)
}
  0x51   :  { %s3872_s23 = smov 128   ;;  %s3873_s0 = smov 8  }
  0x52   :  { %142 = dma.hbm_to_vmem [thread:$0]  %s4588_s16, 1024, %s137_s6, [#allocation15], %s3872_s23, %s3872_s23, %s3873_s0  }
  0x53   :  { %s4604_s5 = sld [smem:[#allocation35_spill]] }
  0x59   :  { %s3673_s25 = scalar_lea.hbm %s4604_s5, 128 }
  0x5a   :  { %p3674_p4 = scmp.ne.s32.totalorder %s4604_s5, %s3673_s25  ;;  %p3677_p5 = scmp.lt.u32.totalorder %s3673_s25, %s4604_s5 }
  0x5c   :  { %p3679_p6 = pnand %p3677_p5, %p3674_p4 }
  0x5e   :  { %3682 = shalt.err (!%p3679_p6)
}
  0x5f   :  { %s3683_s3 = scalar_lea.vmem %s52_s22, 128  ;;  %p3688_p8 = scmp.lt.s32.totalorder %s52_s22, %s52_s22 }
  0x60   :  { %p3684_p7 = scmp.ne.s32.totalorder %s52_s22, %s3683_s3  ;;  %p3689_p9 = scmp.lt.s32.totalorder %s3683_s3, %s3683_s3 }
  0x62   :  { %p3690_p10 = por %p3689_p9, %p3688_p8 }
  0x64   :  { %p3691_p11 = pnand %p3690_p10, %p3684_p7 }
  0x66   :  { %3694 = shalt.err (!%p3691_p11)
}
  0x67   :  { %54 = dma.hbm_to_vmem [thread:$0]  %s4604_s5, 128, %s52_s22, [#allocation3]  }
  0x68   :  { %s3874_s28 = smov [#allocation7]   ;;  %s3875_s11 = smov [#allocation10]  }
  0x69   :  { %s70_s29 = sshll.u32 %s3874_s28, 4  ;;  %s92_s8 = sshll.u32 %s3875_s11, 4  ;;  %s71_s29 = int_to_ptr.vmem [resolvable:$true] %s70_s29  ;;  %s93_s8 = int_to_ptr.vmem [resolvable:$true] %s92_s8 }
  0x6a   :  { %s3695_s30 = scalar_lea.hbm %s4579_s7, 256 }
  0x6b   :  { %p3696_p12 = scmp.ne.s32.totalorder %s4579_s7, %s3695_s30  ;;  %p3699_p13 = scmp.lt.u32.totalorder %s3695_s30, %s4579_s7 }
  0x6d   :  { %p3701_p0 = pnand %p3699_p13, %p3696_p12 }
  0x6f   :  { %3704 = shalt.err (!%p3701_p0)
}
  0x70   :  { %s3705_s22 = scalar_lea.vmem %s71_s29, 256  ;;  %p3710_p2 = scmp.lt.s32.totalorder %s71_s29, %s71_s29 }
  0x71   :  { %p3706_p1 = scmp.ne.s32.totalorder %s71_s29, %s3705_s22  ;;  %p3711_p3 = scmp.lt.s32.totalorder %s3705_s22, %s3705_s22 }
  0x73   :  { %p3712_p4 = por %p3711_p3, %p3710_p2 }
  0x75   :  { %p3713_p5 = pnand %p3712_p4, %p3706_p1 }
  0x77   :  { %3716 = shalt.err (!%p3713_p5)
}
  0x78   :  { %76 = dma.hbm_to_vmem [thread:$0]  %s4579_s7, 256, %s71_s29, [#allocation6], %s3872_s23, %s3872_s23, %s3873_s0  }
  0x79   :  { %s3717_s6 = scalar_lea.hbm %s4581_s9, 256 }
  0x7a   :  { %p3718_p6 = scmp.ne.s32.totalorder %s4581_s9, %s3717_s6  ;;  %p3721_p7 = scmp.lt.u32.totalorder %s3717_s6, %s4581_s9 }
  0x7c   :  { %p3723_p8 = pnand %p3721_p7, %p3718_p6 }
  0x7e   :  { %3726 = shalt.err (!%p3723_p8)
}
  0x7f   :  { %s3727_s30 = scalar_lea.vmem %s93_s8, 256  ;;  %p3732_p10 = scmp.lt.s32.totalorder %s93_s8, %s93_s8 }
  0x80   :  { %p3728_p9 = scmp.ne.s32.totalorder %s93_s8, %s3727_s30  ;;  %p3733_p11 = scmp.lt.s32.totalorder %s3727_s30, %s3727_s30 }
  0x82   :  { %p3734_p12 = por %p3733_p11, %p3732_p10 }
  0x84   :  { %p3735_p13 = pnand %p3734_p12, %p3728_p9 }
  0x86   :  { %3738 = shalt.err (!%p3735_p13)
}
  0x87   :  { %98 = dma.hbm_to_vmem [thread:$0]  %s4581_s9, 256, %s93_s8, [#allocation9], %s3872_s23, %s3872_s23, %s3873_s0  }
  0x88   :  { %s3876_s25 = smov [#allocation13]   ;;  %s3877_s24 = smov [#allocation16]  }
  0x89   :  { %s124_s1 = sshll.u32 %s3876_s25, 4  ;;  %s149_s2 = sshll.u32 %s3877_s24, 4  ;;  %s125_s1 = int_to_ptr.vmem [resolvable:$true] %s124_s1  ;;  %s150_s2 = int_to_ptr.vmem [resolvable:$true] %s149_s2 }
  0x8a   :  { %s3739_s26 = scalar_lea.hbm %s4587_s15, 1024 }
  0x8b   :  { %p3740_p0 = scmp.ne.s32.totalorder %s4587_s15, %s3739_s26  ;;  %p3743_p1 = scmp.lt.u32.totalorder %s3739_s26, %s4587_s15 }
  0x8d   :  { %p3745_p2 = pnand %p3743_p1, %p3740_p0 }
  0x8f   :  { %3748 = shalt.err (!%p3745_p2)
}
  0x90   :  { %s3749_s9 = scalar_lea.vmem %s125_s1, 1024  ;;  %p3754_p4 = scmp.lt.s32.totalorder %s125_s1, %s125_s1 }
  0x91   :  { %p3750_p3 = scmp.ne.s32.totalorder %s125_s1, %s3749_s9  ;;  %p3755_p5 = scmp.lt.s32.totalorder %s3749_s9, %s3749_s9 }
  0x93   :  { %p3756_p6 = por %p3755_p5, %p3754_p4 }
  0x95   :  { %p3757_p7 = pnand %p3756_p6, %p3750_p3 }
  0x97   :  { %3760 = shalt.err (!%p3757_p7)
}
  0x98   :  { %130 = dma.hbm_to_vmem [thread:$0]  %s4587_s15, 1024, %s125_s1, [#allocation12], %s3872_s23, %s3872_s23, %s3873_s0  }
  0x99   :  { %s3761_s30 = scalar_lea.hbm %s4589_s17, 16 }
  0x9a   :  { %p3762_p8 = scmp.ne.s32.totalorder %s4589_s17, %s3761_s30  ;;  %p3765_p9 = scmp.lt.u32.totalorder %s3761_s30, %s4589_s17 }
  0x9c   :  { %p3767_p10 = pnand %p3765_p9, %p3762_p8 }
  0x9e   :  { %3770 = shalt.err (!%p3767_p10)
}
  0x9f   :  { %s3771_s22 = scalar_lea.vmem %s150_s2, 16  ;;  %s3775_s5 = scalar_lea.vmem %s150_s2, 32 }
  0xa0   :  { %p3772_p11 = scmp.ne.s32.totalorder %s150_s2, %s3771_s22  ;;  %p3776_p12 = scmp.lt.s32.totalorder %s150_s2, %s150_s2 }
  0xa1   :  { %p3777_p13 = scmp.lt.s32.totalorder %s3775_s5, %s3771_s22 }
  0xa3   :  { %p3778_p0 = por %p3777_p13, %p3776_p12 }
  0xa5   :  { %p3779_p1 = pnand %p3778_p0, %p3772_p11 }
  0xa7   :  { %3782 = shalt.err (!%p3779_p1)
}
  0xa8   :  { %152 = dma.hbm_to_vmem [thread:$0]  %s4589_s17, 16, %s150_s2, [#allocation15]  }
  0xa9   :  { %s3878_s0 = smov [#allocation17]   ;;  %s3783_s16 = scalar_lea.hbm %s4591_s19, 16 }
  0xaa   :  { %s161_s1 = sshll.u32 %s3878_s0, 4  ;;  %p3784_p2 = scmp.ne.s32.totalorder %s4591_s19, %s3783_s16  ;;  %s162_s1 = int_to_ptr.vmem [resolvable:$true] %s161_s1 }
  0xab   :  { %p3787_p3 = scmp.lt.u32.totalorder %s3783_s16, %s4591_s19 }
  0xad   :  { %p3789_p4 = pnand %p3787_p3, %p3784_p2 }
  0xaf   :  { %3792 = shalt.err (!%p3789_p4)
}
  0xb0   :  { %s3793_s11 = scalar_lea.vmem %s162_s1, 16  ;;  %s3797_s17 = scalar_lea.vmem %s162_s1, 32 }
  0xb1   :  { %p3794_p5 = scmp.ne.s32.totalorder %s162_s1, %s3793_s11  ;;  %p3798_p6 = scmp.lt.s32.totalorder %s162_s1, %s162_s1 }
  0xb2   :  { %p3799_p7 = scmp.lt.s32.totalorder %s3797_s17, %s3793_s11 }
  0xb4   :  { %p3800_p8 = por %p3799_p7, %p3798_p6 }
  0xb6   :  { %p3801_p9 = pnand %p3800_p8, %p3794_p5 }
  0xb8   :  { %3804 = shalt.err (!%p3801_p9)
}
  0xb9   :  { %164 = dma.hbm_to_vmem [thread:$0]  %s4591_s19, 16, %s162_s1, [#allocation18]  }
  0xba   :  { %3849 = dma.done.wait [#allocation3], 128  }
  0xbb   :  { %3850 = vsyncadd [#allocation3], 4294967168 }
  0xbc   :  { %3851 = dma.done.wait [#allocation6], 272  }
  0xbd   :  { %3852 = vsyncadd [#allocation6], 4294967024 }
  0xbe   :  { %3853 = dma.done.wait [#allocation9], 272  }
  0xbf   :  { %3854 = vsyncadd [#allocation9], 4294967024 }
  0xc0   :  { %3855 = dma.done.wait [#allocation12], 1056  }
  0xc1   :  { %3856 = vsyncadd [#allocation12], 4294966240 }
  0xc2   :  { %3857 = dma.done.wait [#allocation15], 1040  }
  0xc3   :  { %3858 = vsyncadd [#allocation15], 4294966256 }
  0xc4   :  { %3859 = dma.done.wait [#allocation18], 16  }
  0xc5   :  { %3860 = vsyncadd [#allocation18], 4294967280  ;;  %vm205_vm0 = vcmask 64512   ;;  %v197_v0 = vld [vmem:[#allocation2] sm:$0xff]  ;;  %s4605_s7 = sld [smem:[#allocation30_spill]]  ;;  %v287_v3 = vld [vmem:[#allocation7] sm:$0xff] }
  0xc6   :  { %3028 = vmatprep.subr.mxu0 %v197_v0  ;;  %v288_v4 = vld [vmem:[#allocation7 + $0x8] sm:$0xff]  ;;  %v2819_v6 = vld [vmem:[#allocation5] ss:$0 sm:$0xff]  ;;  %vm296_vm1 = vcmask 130048   ;;  %v380_v11 = vld [vmem:[#allocation10] sm:$0xff]  ;;  %s4606_s22 = sld [smem:[#allocation31_spill]] }
  0xc7   :  { %3029 = vmatpush3.msra.mxu0 %v197_v0  ;;  %v3332_v5 = vpack.c.bf16 %v288_v4, %v287_v3  ;;  %v381_v12 = vld [vmem:[#allocation10 + $0x8] sm:$0xff]  ;;  %v2822_v14 = vld [vmem:[#allocation8] ss:$0 sm:$0xff]  ;;  %v555_v22 = vld [vmem:[%s4582_s10 + $0x10] sm:$0xff]  ;;  %vm561_vm2 = vcmask 523264   ;;  %s4607_s29 = sld [smem:[#allocation33_spill]]  ;;  %v892_v3 = vlaneseq }
  0xc8   :  { %v3336_v13 = vpack.c.bf16 %v381_v12, %v380_v11  ;;  %v553_v20 = vld [vmem:[%s4582_s10] sm:$0xff]  ;;  %v554_v21 = vld [vmem:[%s4582_s10 + $0x8] sm:$0xff]  ;;  %v556_v24 = vld [vmem:[%s4582_s10 + $0x18] sm:$0xff]  ;;  %v3879_v47 = vmov 0.0   ;;  %vm3880_vm3 = vmmov 0   ;;  %vm819_vm4 = vcmask 1043456  }
  0xc9   :  { %3333 = vmatprep.subr.bf16.mxu1 %v3332_v5  ;;  %v3344_v23 = vpack.c.bf16 %v554_v21, %v553_v20  ;;  %v3348_v25 = vpack.c.bf16 %v556_v24, %v555_v22  ;;  %v557_v26 = vld [vmem:[%s4582_s10 + $0x20] sm:$0xff]  ;;  %v558_v27 = vld [vmem:[%s4582_s10 + $0x28] sm:$0xff]  ;;  %v559_v33 = vld [vmem:[%s4582_s10 + $0x30] sm:$0xff]  ;;  %vm815_vm5 = vcmask 31744   ;;  %v4205_v4 = vshrl.u32 %v892_v3, 7  ;;  %s4608_s24 = sld [smem:[#allocation32_spill]] }
  0xca   :  { %3335 = vmatpush3.bf16.msra.mxu1 %v3332_v5  ;;  %3337 = vmatprep.subr.bf16.mxu0 %v3336_v13  ;;  %v3352_v28 = vpack.c.bf16 %v558_v27, %v557_v26  ;;  %v560_v34 = vld [vmem:[%s4582_s10 + $0x38] sm:$0xff]  ;;  %v2827_v36 = vld [vmem:[#allocation11] ss:$0 sm:$0xff]  ;;  %v2832_v48 = vld [vmem:[#allocation11 + $0x1] ss:$0 sm:$0xff]  ;;  %v3881_v20 = vmov 0.0|0.0  }
  0xcb   :  { %v195_v1 = vld [vmem:[%s4605_s7] sm:$0xff]  ;;  %v196_v2 = vld [vmem:[%s4605_s7 + $0x8] sm:$0xff]  ;;  %v3356_v35 = vpack.c.bf16 %v560_v34, %v559_v33  ;;  %v894_v5 = vsub.s32 0, %v4205_v4  ;;  %vm1258_vm6 = vcmask 123904   ;;  %s4609_s15 = sld [smem:[#allocation34_spill]]  ;;  %vm4339_vm7 = vmpackc.low %vm296_vm1, %vm296_vm1  ;;  %s3883_s8 = smov 96  }
  0xcc   :  { %3030 = vmatprep.mubr.msk.f32.mxu0 %vm205_vm0, %v195_v1  ;;  %v378_v19 = vld [vmem:[%s4606_s22] sm:$0xff]  ;;  %v379_v32 = vld [vmem:[%s4606_s22 + $0x8] sm:$0xff]  ;;  %s3884_s11 = smov 80   ;;  %vm1226_vm10 = vcmask 27648   ;;  %vm2770_vm11 = vcmask 17408   ;;  %s3886_s10 = smov [#allocation20]  }
  0xcd   :  { %3031 = vmatmul.mubr.msk.f32.vlgmr.msra.gmra.mrb[0].mxu0 %vm205_vm0, %v196_v2  ;;  %v4178_v46 = vld [vmem:[%s4607_s29] sm:$0xf]  ;;  %s2801_s7 = sshll.u32 %s3886_s10, 4  ;;  %vm1255_vm12 = vcmask 0   ;;  %s2802_s7 = int_to_ptr.vmem [resolvable:$true] %s2801_s7 }
  0xce   :  { %3339 = vmatpush3.bf16.msra.mxu0 %v3336_v13 }
  0xcf   :  { %3345 = vmatprep.subr.bf16.mxu0 %v3344_v23  ;;  %v4224_v21 = vld [vmem:[%s4608_s24] sm:$0x3] }
  0xd0   :  { %v1259_v22 = vsel %vm1258_vm6, %v4224_v21, 0.0  ;;  %vm1671_vm8 = vcmp.gt.f32.partialorder %v4224_v21, 0.0 }
  0xd1   :  { %1260 = vadd.xlane.f32.xlu1 %v1259_v22  ;;  %v1059_v24 = vld [vmem:[%s4609_s15] sm:$0xff]  ;;  %v1511_v22 = vld [vmem:[%s4584_s12 + $0x8] sm:$0xff] }
 0x1a0   :  { %v3032_v7 = vpop.f32.mrb[0].mxu0 }
 0x1a1   :  { %v278_v8 = vpop.f32.mrb[1].mxu0  ;;  %v284_v10 = vadd.f32 %v3032_v7, %v2819_v6 }
 0x1a2   :  { %v279_v9 = vadd.f32 %v2819_v6, %v278_v8 }
 0x1a4   :  { %3037 = vmatprep.mubr.msk.f32.mxu1 %vm296_vm1, %v279_v9 }
 0x1a5   :  { %3038 = vmatmul.mubr.msk.f32.vlgmr.msra.gmra.mrb[0].mxu1 %vm296_vm1, %v284_v10 }
 0x1a6   :  { %3051 = vmatprep.mubr.msk.f32.mxu1 %vm296_vm1, %v378_v19 }
 0x278   :  { %v3039_v15 = vpop.f32.mrb[0].mxu1 }
 0x279   :  { %v369_v16 = vpop.f32.mrb[1].mxu1  ;;  %v375_v18 = vadd.f32 %v3039_v15, %v2822_v14 }
 0x27a   :  { %v370_v17 = vadd.f32 %v2822_v14, %v369_v16 }
 0x27c   :  { %3044 = vmatprep.mubr.msk.f32.mxu0 %vm296_vm1, %v370_v17 }
 0x27d   :  { %3045 = vmatmul.mubr.msk.f32.vlgmr.msra.gmra.mrb[2].mxu0 %vm296_vm1, %v375_v18 }
 0x27e   :  { %3347 = vmatpush3.bf16.msra.mxu0 %v3344_v23  ;;  %v1060_v23 = vld [vmem:[%s4609_s15 + $0x8] sm:$0xff] }
 0x27f   :  { %3349 = vmatprep.subr.bf16.mxu0 %v3348_v25 }
 0x282   :  { %3351 = vmatpush3.bf16.msra.mxu0 %v3348_v25 }
 0x283   :  { %3353 = vmatprep.subr.bf16.mxu0 %v3352_v28 }
 0x286   :  { %3355 = vmatpush3.bf16.msra.mxu0 %v3352_v28 }
 0x287   :  { %3357 = vmatprep.subr.bf16.mxu0 %v3356_v35 }
 0x28a   :  { %3359 = vmatpush3.bf16.msra.mxu0 %v3356_v35 }
 0x350   :  { %v3046_v29 = vpop.f32.mrb[2].mxu0 }
 0x351   :  { %v454_v30 = vpop.f32.mrb[3].mxu0 }
 0x352   :  { %v3340_v31 = vpack.c.bf16 %v3046_v29, %v454_v30  ;;  %v1062_v30 = vld [vmem:[%s4609_s15 + $0x18] sm:$0xff] }
 0x354   :  { %3341 = vmatprep.subr.bf16.mxu1 %v3340_v31 }
 0x355   :  { %3343 = vmatpush3.bf16.msra.mxu1 %v3340_v31  ;;  %v1061_v31 = vld [vmem:[%s4609_s15 + $0x10] sm:$0xff] }
 0x358   :  { %3052 = vmatmul.mubr.msk.f32.vlgmr.msra.gmra.mrb[2].mxu1 %vm296_vm1, %v379_v32 }
 0x359   :  { %3077 = vmatprep.mubr.msk.f32.mxu1 %vm296_vm1, %v378_v19 }
 0x42b   :  { %v3053_v37 = vpop.f32.mrb[2].mxu1 }
 0x42c   :  { %v548_v38 = vadd.f32 %v3053_v37, %v2827_v36  ;;  %v542_v39 = vpop.f32.mrb[3].mxu1  ;;  %v1064_v37 = vld [vmem:[%s4609_s15 + $0x28] sm:$0xff] }
 0x42d   :  { %v543_v40 = vadd.f32 %v2827_v36, %v542_v39 }
 0x42e   :  { %v552_v42 = vmax.f32 %v548_v38, 0.0  ;;  %v1063_v38 = vld [vmem:[%s4609_s15 + $0x20] sm:$0xff] }
 0x42f   :  { %v551_v41 = vmax.f32 %v543_v40, 0.0 }
 0x431   :  { %3070 = vmatprep.mubr.msk.f32.mxu0 %vm561_vm2, %v551_v41 }
 0x432   :  { %3071 = vmatmul.mubr.msk.f32.vlgmr.msra.gmra.mrb[4].mxu0 %vm561_vm2, %v552_v42 }
 0x505   :  { %v3072_v43 = vpop.f32.mrb[4].mxu0 }
 0x506   :  { %v634_v44 = vpop.f32.mrb[5].mxu0 }
 0x507   :  { %v3360_v45 = vpack.c.bf16 %v3072_v43, %v634_v44  ;;  %v1066_v44 = vld [vmem:[%s4609_s15 + $0x38] sm:$0xff] }
 0x509   :  { %3361 = vmatprep.subr.bf16.mxu1 %v3360_v45 }
 0x50a   :  { %3363 = vmatpush3.bf16.msra.mxu1 %v3360_v45  ;;  %v1065_v45 = vld [vmem:[%s4609_s15 + $0x30] sm:$0xff] }
 0x50b   :  { %3080 = vmatprep.subr.mxu1 %v3879_v47 }
 0x50d   :  { %3078 = vmatmul.mubr.msk.f32.vlgmr.msra.gmra.mrb[4].mxu1 %vm296_vm1, %v379_v32 }
 0x50e   :  { %3082 = vmatprep.mubr.msk.f32.mxu1 %vm3880_vm3, %v3879_v47 }
 0x513   :  { %3081 = vmatpush3.xpose.msk.msra.mxu1 %vm561_vm2, %v4178_v46 }
 0x514   :  { %3085 = vmatprep.subr.mxu1 %v3879_v47 }
 0x5e0   :  { %v3079_v49 = vpop.f32.mrb[4].mxu1 }
 0x5e1   :  { %v723_v50 = vadd.f32 %v3079_v49, %v2832_v48  ;;  %v717_v51 = vpop.f32.mrb[5].mxu1  ;;  %v1264_v49 = vld [vmem:[%s4585_s13] sm:$0xff] }
 0x5e2   :  { %v718_v52 = vadd.f32 %v2832_v48, %v717_v51 }
 0x5e3   :  { %v4186_v53 = vmax.f32 %v723_v50, 0.0  ;;  %v1265_v50 = vld [vmem:[%s4585_s13 + $0x8] sm:$0xff] }
 0x5e4   :  { %v4188_v54 = vmax.f32 %v718_v52, 0.0 }
 0x5e5   :  { %v730_v55 = vsel %vm561_vm2, %v4186_v53, 0.0 }
 0x5e6   :  { %v729_v56 = vsel %vm561_vm2, %v4188_v54, 0.0 }
 0x5e7   :  { %v731_v57 = vadd.f32 %v730_v55, %v729_v56  ;;  %v3380_v56 = vpack.c.bf16 %v1265_v50, %v1264_v49 }
 0x5e9   :  { %v732_v58 = vrot.slane %v731_v57, 4 }
 0x5eb   :  { %v733_v59 = vadd.f32 %v732_v58, %v731_v57  ;;  %v1266_v58 = vld [vmem:[%s4585_s13 + $0x10] sm:$0xff] }
 0x5ed   :  { %v734_v60 = vrot.slane %v733_v59, 2 }
 0x5ef   :  { %v735_v61 = vadd.f32 %v734_v60, %v733_v59  ;;  %v1267_v59 = vld [vmem:[%s4585_s13 + $0x18] sm:$0xff] }
 0x5f0   :  { %v3384_v60 = vpack.c.bf16 %v1267_v59, %v1266_v58 }
 0x5f1   :  { %v736_v62 = vrot.slane %v735_v61, 1 }
 0x5f3   :  { %v737_v63 = vadd.f32 %v736_v62, %v735_v61  ;;  %v1268_v61 = vld [vmem:[%s4585_s13 + $0x20] sm:$0xff]  ;;  %v1269_v62 = vld [vmem:[%s4585_s13 + $0x28] sm:$0xff] }
 0x5f5   :  { %3083 = vmatmul.mubr.msk.f32.vlgmr.msra.gmra.mrb[6].mxu1 %vm561_vm2, %v737_v63  ;;  %v3388_v63 = vpack.c.bf16 %v1269_v62, %v1268_v61 }
 0x5f6   :  { %3087 = vmatprep.mubr.msk.f32.mxu1 %vm3880_vm3, %v3879_v47  ;;  %3086 = vmatpush3.msk.msra.mxu1 %vm819_vm4, %v4178_v46 }
 0x5f7   :  { %3125 = vmatprep.subr.mxu1 %v3879_v47 }
 0x6c8   :  { %v810_v0 = vpop.f32.mrb[6].mxu1 }
 0x6c9   :  { %v814_v1 = vmul.f32 0.00390625, %v810_v0  ;;  %v3084_v2 = vpop.f32.mrb[7].mxu1  ;;  %v1270_v0 = vld [vmem:[%s4585_s13 + $0x30] sm:$0xff] }
 0x6cb   :  { %3088 = vmatmul.mubr.msk.f32.vlgmr.msra.gmra.mrb[8].mxu1 %vm815_vm5, %v814_v1  ;;  %v1271_v1 = vld [vmem:[%s4585_s13 + $0x38] sm:$0xff] }
 0x6cc   :  { %3126 = vmatpush3.xpose.msk.msra.mxu1 %vm561_vm2, %v4178_v46  ;;  %3127 = vmatprep.mubr.msk.f32.mxu1 %vm3880_vm3, %v3879_v47  ;;  %v3392_v2 = vpack.c.bf16 %v1271_v1, %v1270_v0 }
 0x79e   :  { %v888_v6 = vpop.f32.mrb[8].mxu1 }
 0x79f   :  { %v895_v7 = vrot.slane %v888_v6, %v894_v5  ;;  %v3089_v8 = vpop.f32.mrb[9].mxu1  ;;  %v1353_v5 = vld [vmem:[%s4586_s14] sm:$0xff]  ;;  %v1354_v6 = vld [vmem:[%s4586_s14 + $0x8] sm:$0xff] }
 0x7a0   :  { %v1355_v8 = vld [vmem:[%s4586_s14 + $0x10] sm:$0xff] }
 0x7a1   :  { %v897_v9 = vsub.f32 %v4186_v53, %v895_v7  ;;  %v896_v10 = vsub.f32 %v4188_v54, %v895_v7  ;;  %v3396_v7 = vpack.c.bf16 %v1354_v6, %v1353_v5 }
 0x7a3   :  { %898 = vxpose.xlu0.b32.start [1/2] (short) (narrow) %v896_v10, 64  ;;  %v3364_v11 = vpack.c.bf16 %v897_v9, %v896_v10  ;;  %3397 = vmatprep.subr.bf16.mxu1 %v3396_v7 }
 0x7a5   :  { %3365 = vmatprep.subr.bf16.mxu0 %v3364_v11 }
 0x7a6   :  { %3367 = vmatpush3.bf16.msra.mxu0 %v3364_v11 }
 0x7a7   :  { %899 = vxpose.xlu0.b32.end [2/2] (short) (narrow) %v897_v9, 64  ;;  %3368 = vmatprep.subr.bf16.mxu0 %v3881_v20  ;;  %v1356_v9 = vld [vmem:[%s4586_s14 + $0x18] sm:$0xff] }
 0x7a8   :  { %v3400_v10 = vpack.c.bf16 %v1356_v9, %v1355_v8 }
 0x823   :  { %v914_v12 = vpop.trf.xlu0 }
 0x824   :  { %3094 = vmatprep.mubr.msk.f32.mxu0 %vm296_vm1, %v914_v12  ;;  %v1357_v12 = vld [vmem:[%s4586_s14 + $0x20] sm:$0xff] }
 0x827   :  { %v915_v13 = vpop.trf.xlu0 }
 0x828   :  { %3095 = vmatmul.mubr.msk.f32.vlgmr.msra.gmra.mrb[6].mxu0 %vm296_vm1, %v915_v13  ;;  %v1358_v13 = vld [vmem:[%s4586_s14 + $0x28] sm:$0xff] }
 0x82b   :  { %v916_v14 = vpop.trf.xlu0 }
 0x82c   :  { %3097 = vmatprep.mubr.msk.f32.mxu0 %vm296_vm1, %v916_v14 }
 0x82f   :  { %v917_v15 = vpop.trf.xlu0 }
 0x830   :  { %3098 = vmatmul.mubr.msk.f32.gmra.mrb[8].mxu0 %vm296_vm1, %v917_v15  ;;  %v3404_v15 = vpack.c.bf16 %v1358_v13, %v1357_v12 }
 0x833   :  { %v918_v16 = vpop.trf.xlu0 }
 0x834   :  { %3100 = vmatprep.mubr.msk.f32.mxu0 %vm296_vm1, %v918_v16  ;;  %v1359_v16 = vld [vmem:[%s4586_s14 + $0x30] sm:$0xff] }
 0x837   :  { %v919_v17 = vpop.trf.xlu0 }
 0x838   :  { %3101 = vmatmul.mubr.msk.f32.gmra.mrb[10].mxu0 %vm296_vm1, %v919_v17  ;;  %v1360_v17 = vld [vmem:[%s4586_s14 + $0x38] sm:$0xff] }
 0x83b   :  { %v920_v18 = vpop.trf.xlu0 }
 0x83c   :  { %3103 = vmatprep.mubr.msk.f32.mxu0 %vm296_vm1, %v920_v18  ;;  %v3408_v18 = vpack.c.bf16 %v1360_v17, %v1359_v16 }
 0x83f   :  { %v921_v19 = vpop.trf.xlu0 }
 0x840   :  { %3104 = vmatmul.mubr.msk.f32.gmra.mrb[12].mxu0 %vm296_vm1, %v921_v19  ;;  %v1261_v19 = vpop.xlane.xlu1 %1260 }
 0x841   :  { %3122 = vmatprep.mubr.msk.f32.mxu0 %vm3880_vm3, %v3879_v47 }
 0x8fb   :  { %v3096_v25 = vpop.f32.mrb[6].mxu0 }
 0x8fc   :  { %v1068_v26 = vmul.f32 %v3096_v25, %v1060_v23  ;;  %v1020_v27 = vpop.f32.mrb[7].mxu0  ;;  %v1262_v23 = vmax.f32 %v1261_v19, 1.0  ;;  %v1512_v25 = vld [vmem:[%s4584_s12 + $0x10] sm:$0xff] }
 0x8fd   :  { %v1067_v28 = vmul.f32 %v1059_v24, %v1020_v27 }
 0x8fe   :  { %3561 = vrcp.f32 %v1262_v23 }
 0x8ff   :  { %v3369_v29 = vpack.c.bf16 %v1068_v26, %v1067_v28  ;;  %v1513_v26 = vld [vmem:[%s4584_s12 + $0x18] sm:$0xff] }
 0x901   :  { %3370 = vmatpush3.bf16.msra.mxu0 %v3369_v29 }
 0x902   :  { %3371 = vmatprep.subr.bf16.mxu0 %v3881_v20 }
 0x903   :  { %v3099_v32 = vpop.f32.mrb[8].mxu0 }
 0x904   :  { %v1070_v33 = vmul.f32 %v3099_v32, %v1062_v30  ;;  %v1030_v34 = vpop.f32.mrb[9].mxu0  ;;  %v3419_v30 = vpack.c.bf16 %v1513_v26, %v1512_v25 }
 0x905   :  { %v1069_v35 = vmul.f32 %v1061_v31, %v1030_v34 }
 0x907   :  { %v3372_v36 = vpack.c.bf16 %v1070_v33, %v1069_v35  ;;  %v1515_v33 = vld [vmem:[%s4584_s12 + $0x28] sm:$0xff] }
 0x909   :  { %3373 = vmatpush3.bf16.msra.mxu0 %v3372_v36 }
 0x90a   :  { %3374 = vmatprep.subr.bf16.mxu0 %v3881_v20 }
 0x90b   :  { %v3102_v39 = vpop.f32.mrb[10].mxu0 }
 0x90c   :  { %v1072_v40 = vmul.f32 %v3102_v39, %v1064_v37  ;;  %v1040_v41 = vpop.f32.mrb[11].mxu0  ;;  %v1516_v37 = vld [vmem:[%s4584_s12 + $0x30] sm:$0xff]  ;;  %v3562_v39 = vpop.eup %3561 }
 0x90d   :  { %v1071_v42 = vmul.f32 %v1063_v38, %v1040_v41  ;;  %v1517_v38 = vld [vmem:[%s4584_s12 + $0x38] sm:$0xff] }
 0x90f   :  { %v3375_v43 = vpack.c.bf16 %v1072_v40, %v1071_v42  ;;  %v3425_v40 = vpack.c.bf16 %v1517_v38, %v1516_v37 }
 0x911   :  { %3376 = vmatpush3.bf16.msra.mxu0 %v3375_v43 }
 0x912   :  { %3377 = vmatprep.subr.bf16.mxu0 %v3881_v20 }
 0x913   :  { %v3105_v48 = vpop.f32.mrb[12].mxu0 }
 0x914   :  { %v1074_v51 = vmul.f32 %v3105_v48, %v1066_v44  ;;  %v1050_v52 = vpop.f32.mrb[13].mxu0 }
 0x915   :  { %v1073_v55 = vmul.f32 %v1065_v45, %v1050_v52 }
 0x917   :  { %v3378_v57 = vpack.c.bf16 %v1074_v51, %v1073_v55 }
 0x919   :  { %3379 = vmatpush3.bf16.msra.mxu0 %v3378_v57 }
 0x91a   :  { %3381 = vmatprep.subr.bf16.mxu0 %v3380_v56 }
 0x91c   :  { %3123 = vmatmul.mubr.msk.f32.vlgmr.msra.gmra.mrb[14].mxu0 %vm561_vm2, %v4178_v46  ;;  %v3413_v46 = vpack.c.bf16 %v4186_v53, %v4188_v54 }
 0x91d   :  { %3383 = vmatpush3.bf16.msra.mxu0 %v3380_v56  ;;  %3146 = vmatprep.mubr.msk.f32.mxu0 %vm561_vm2, %v4188_v54 }
 0x91e   :  { %3385 = vmatprep.subr.bf16.mxu0 %v3384_v60 }
 0x921   :  { %3387 = vmatpush3.bf16.msra.mxu0 %v3384_v60 }
 0x922   :  { %3389 = vmatprep.subr.bf16.mxu0 %v3388_v63 }
 0x925   :  { %3391 = vmatpush3.bf16.msra.mxu0 %v3388_v63 }
 0x926   :  { %3393 = vmatprep.subr.bf16.mxu0 %v3392_v2 }
 0x929   :  { %3395 = vmatpush3.bf16.msra.mxu0 %v3392_v2 }
 0x92a   :  { %3412 = vmatprep.subr.bf16.mxu0 %v3881_v20 }
 0x92c   :  { %3147 = vmatmul.mubr.msk.f32.vlgmr.msra.gmra.mrb[16].mxu0 %vm561_vm2, %v4186_v53 }
 0x92d   :  { %3414 = vmatpush3.bf16.msra.mxu0 %v3413_v46  ;;  %3172 = vmatprep.mubr.msk.f32.mxu0 %vm3880_vm3, %v3879_v47 }
 0x92e   :  { %3427 = vmatprep.subr.bf16.mxu0 %v3881_v20 }
 0x930   :  { %3173 = vmatmul.mubr.msk.f32.vlgmr.msra.gmra.mrb[18].mxu0 %vm296_vm1, %v4224_v21 }
 0x931   :  { %3198 = vmatprep.mubr.msk.f32.mxu0 %vm3880_vm3, %v3879_v47 }
 0x9ef   :  { %v1141_v11 = vpop.f32.mrb[14].mxu0 }
 0x9f0   :  { %v3124_v14 = vpop.f32.mrb[15].mxu0  ;;  %3128 = vmatmul.mubr.msk.f32.vlgmr.msra.gmra.mrb[10].mxu1 %vm561_vm2, %v1141_v11 }
 0x9f1   :  { %3399 = vmatpush3.bf16.msra.mxu1 %v3396_v7  ;;  %3165 = vmatprep.mubr.msk.f32.mxu1 %vm561_vm2, %v4188_v54  ;;  %v1510_v54 = vld [vmem:[%s4584_s12] sm:$0xff] }
 0x9f2   :  { %3401 = vmatprep.subr.bf16.mxu1 %v3400_v10  ;;  %v3416_v24 = vpack.c.bf16 %v1511_v22, %v1510_v54 }
 0x9f5   :  { %3403 = vmatpush3.bf16.msra.mxu1 %v3400_v10 }
 0x9f6   :  { %3405 = vmatprep.subr.bf16.mxu1 %v3404_v15 }
 0x9f9   :  { %3407 = vmatpush3.bf16.msra.mxu1 %v3404_v15 }
 0x9fa   :  { %3409 = vmatprep.subr.bf16.mxu1 %v3408_v18 }
 0x9fd   :  { %3411 = vmatpush3.bf16.msra.mxu1 %v3408_v18 }
 0x9fe   :  { %3415 = vmatprep.subr.bf16.mxu1 %v3881_v20 }
 0x9ff   :  { %v3148_v27 = vpop.f32.mrb[16].mxu0 }
 0xa00   :  { %3166 = vmatmul.mubr.msk.f32.vlgmr.msra.gmra.mrb[12].mxu1 %vm561_vm2, %v4186_v53  ;;  %v1344_v28 = vpop.f32.mrb[17].mxu0  ;;  %v1514_v53 = vld [vmem:[%s4584_s12 + $0x20] sm:$0xff]  ;;  %s3882_s12 = smov 112  }
 0xa01   :  { %v3428_v31 = vpack.c.bf16 %v3148_v27, %v1344_v28  ;;  %3417 = vmatpush3.bf16.msra.mxu1 %v3416_v24  ;;  %3191 = vmatprep.mubr.msk.f32.mxu1 %vm3880_vm3, %v3879_v47  ;;  %v4345_v32 = vpack.i.bf16 %v3148_v27, %v1344_v28  ;;  %v3422_v36 = vpack.c.bf16 %v1515_v33, %v1514_v53 }
 0xa02   :  { %3418 = vmatprep.subr.bf16.mxu1 %v3881_v20 }
 0xa03   :  { %3430 = vmatpush3.bf16.xpose.msk.msra.mxu0 %vm4339_vm7, %v3428_v31  ;;  %v1505_v34 = vpop.f32.mrb[18].mxu0 }
 0xa04   :  { %v3174_v35 = vpop.f32.mrb[19].mxu0  ;;  %3431 = vmatprep.subr.bf16.mxu0 %v3881_v20  ;;  %v1509_v41 = vmul.f32 %v3562_v39, %v1505_v34 }
 0xa05   :  { %3420 = vmatpush3.bf16.msra.mxu1 %v3419_v30 }
 0xa06   :  { %3421 = vmatprep.subr.bf16.mxu1 %v3881_v20 }
 0xa09   :  { %3423 = vmatpush3.bf16.msra.mxu1 %v3422_v36 }
 0xa0a   :  { %3424 = vmatprep.subr.bf16.mxu1 %v3881_v20 }
 0xa0d   :  { %3426 = vmatpush3.bf16.msra.mxu1 %v3425_v40 }
 0xa0e   :  { %3438 = vmatprep.subr.bf16.mxu1 %v3881_v20 }
 0xa10   :  { %3192 = vmatmul.mubr.msk.f32.vlgmr.msra.gmra.mrb[14].mxu1 %vm561_vm2, %v1509_v41 }
 0xa11   :  { %3219 = vmatprep.mubr.msk.f32.mxu1 %vm3880_vm3, %v3879_v47 }
 0xac3   :  { %v4369_v42 = vpop.f32.mrb[10].mxu1 }
 0xac4   :  { %v3129_v43 = vpop.f32.mrb[11].mxu1 }
 0xad3   :  { %v3167_v44 = vpop.f32.mrb[12].mxu1 }
 0xad4   :  { %v1427_v45 = vpop.f32.mrb[13].mxu1 }
 0xad5   :  { %v3432_v48 = vpack.c.bf16 %v3167_v44, %v1427_v45  ;;  %v4371_v49 = vpack.i.bf16 %v3167_v44, %v1427_v45 }
 0xae3   :  { %v1587_v50 = vpop.f32.mrb[14].mxu1 }
 0xae4   :  { %v4373_v51 = vmul.f32 0.25, %v1587_v50  ;;  %v3193_v52 = vpop.f32.mrb[15].mxu1 }
 0xae6   :  { %3199 = vmatmul.mubr.msk.f32.vlgmr.msra.gmra.mrb[20].mxu0 %vm296_vm1, %v4373_v51 }
 0xae7   :  { %3433 = vmatpush3.bf16.msra.mxu0 %v3432_v48  ;;  %3205 = vmatprep.mubr.msk.f32.mxu0 %vm3880_vm3, %v3879_v47 }
 0xae8   :  { %3434 = vmatprep.subr.bf16.mxu0 %v3881_v20 }
 0xbb9   :  { %v1667_v55 = vpop.f32.mrb[20].mxu0 }
 0xbba   :  { %v1672_v56 = vsel %vm1671_vm8, %v1667_v55, -1e+30  ;;  %v3200_v57 = vpop.f32.mrb[21].mxu0 }
 0xbbb   :  { %v1673_v58 = vsel %vm1258_vm6, %v1672_v56, -inf  ;;  %v1938_v57 = vld [vmem:[#allocation13 + $0x10] sm:$0xff] }
 0xbbc   :  { %1674 = vmax.xlane.f32.xlu1 %v1673_v58  ;;  %v1939_v58 = vld [vmem:[#allocation13 + $0x18] sm:$0xff] }
 0xbcd   :  { %3532 = vrot.lane.b32.xlu1 %v4345_v32, %s3882_s12 }
 0xbd1   :  { %1761 = vrot.lane.b32.xlu1 %v4373_v51, %s3882_s12 }
 0xbd5   :  { %3537 = vrot.lane.b32.xlu1 %v4345_v32, %s3883_s8 }
 0xbd9   :  { %2086 = vrot.lane.b32.xlu1 %v4373_v51, %s3883_s8 }
 0xc49   :  { %v1675_v59 = vpop.xlane.xlu1 %1674 }
 0xc4a   :  { %v1676_v60 = vsub.f32 %v1672_v56, %v1675_v59  ;;  %v3442_v59 = vpack.c.bf16 %v1939_v58, %v1938_v57  ;;  %v2678_v57 = vld [vmem:[%s4590_s18 + $0x8] sm:$0xff]  ;;  %v2679_v58 = vld [vmem:[%s4590_s18 + $0x10] sm:$0xff] }
 0xc4c   :  { %v1677_v61 = vmul.f32 1.442695, %v1676_v60  ;;  %v1221_v60 = vand.u32 127, %v892_v3 }
 0xc4d   :  { %v3533_v46 = vpop.permute.xlu1 %3532 }
 0xc4e   :  { %3563 = vpow2.f32 %v1677_v61  ;;  %v3535_v10 = vunpack.i.h.bf16 %v3533_v46  ;;  %v3534_v11 = vunpack.i.l.bf16 %v3533_v46  ;;  %vm1222_vm9 = vcmp.eq.s32.totalorder %v4205_v4, %v1221_v60  ;;  %v1760_v46 = vld [vmem:[#allocation13 + $0x8] sm:$0xff] }
 0xc4f   :  { %v4440_v61 = vsel %vm1222_vm9, 1.0, %v3879_v47  ;;  %v2680_v60 = vld [vmem:[%s4590_s18 + $0x18] sm:$0xff] }
 0xc50   :  { %v3435_v14 = vpack.c.bf16 %v3535_v10, %v3534_v11 }
 0xc51   :  { %v1762_v9 = vpop.permute.xlu1 %1761 }
 0xc55   :  { %v3538_v15 = vpop.permute.xlu1 %3537 }
 0xc56   :  { %v3540_v16 = vunpack.i.h.bf16 %v3538_v15  ;;  %v3539_v17 = vunpack.i.l.bf16 %v3538_v15 }
 0xc58   :  { %v3564_v62 = vpop.eup %3563  ;;  %v3448_v18 = vpack.c.bf16 %v3540_v16, %v3539_v17  ;;  %v2261_v16 = vld [vmem:[#allocation13 + $0x20] sm:$0xff]  ;;  %v2262_v17 = vld [vmem:[#allocation13 + $0x28] sm:$0xff] }
 0xc59   :  { %v1679_v63 = vmul.f32 %v3564_v62, %v4224_v21  ;;  %v2087_v19 = vpop.permute.xlu1 %2086  ;;  %v1225_v62 = vmul.f32 %v4440_v61, %v4369_v42 }
 0xc5b   :  { %v1680_v0 = vsel %vm1258_vm6, %v1679_v63, 0.0 }
 0xc5c   :  { %1681 = vadd.xlane.f32.xlu0 %v1680_v0 }
 0xc72   :  { %3542 = vrot.lane.b32.xlu0 %v4371_v49, %s3882_s12 }
 0xce9   :  { %v1682_v1 = vpop.xlane.xlu0 %1681 }
 0xcea   :  { %v1683_v2 = vmax.f32 %v1682_v1, 1e-30 }
 0xcec   :  { %3565 = vrcp.f32 %v1683_v2  ;;  %v1759_v2 = vld [vmem:[#allocation13] sm:$0xff] }
 0xced   :  { %v3543_v5 = vpop.permute.xlu0 %3542  ;;  %v3445_v3 = vpack.c.bf16 %v1760_v46, %v1759_v2  ;;  %v2683_v2 = vld [vmem:[%s4590_s18 + $0x30] sm:$0xff]  ;;  %v2684_v46 = vld [vmem:[%s4590_s18 + $0x38] sm:$0xff] }
 0xcee   :  { %v3545_v6 = vunpack.i.h.bf16 %v3543_v5  ;;  %v3544_v7 = vunpack.i.l.bf16 %v3543_v5 }
 0xcf0   :  { %v3439_v8 = vpack.c.bf16 %v3545_v6, %v3544_v7 }
 0xcf2   :  { %3440 = vmatpush3.bf16.msra.mxu1 %v3439_v8 }
 0xcf3   :  { %3441 = vmatprep.subr.bf16.mxu1 %v3881_v20 }
 0xcf6   :  { %v3566_v12 = vpop.eup %3565 }
 0xcf7   :  { %v1685_v13 = vmul.f32 %v3566_v12, %v1679_v63  ;;  %v4445_v63 = vsel %vm1226_vm10, %v1225_v62, 0.0  ;;  %v3483_v62 = vpack.c.bf16 %v2680_v60, %v2679_v58 }
 0xcf9   :  { %3206 = vmatmul.mubr.msk.f32.vlgmr.msra.gmra.mrb[22].mxu0 %vm296_vm1, %v1685_v13 }
 0xcfa   :  { %3437 = vmatpush3.bf16.xpose.msk.msra.mxu0 %vm4339_vm7, %v3435_v14  ;;  %3212 = vmatprep.mubr.msk.f32.mxu0 %vm3880_vm3, %v3879_v47 }
 0xcfb   :  { %3447 = vmatprep.subr.bf16.mxu0 %v3881_v20 }
 0xd01   :  { %3213 = vmatmul.mubr.msk.f32.vlgmr.msra.gmra.mrb[24].mxu0 %vm296_vm1, %v1762_v9 }
 0xd02   :  { %3450 = vmatpush3.bf16.xpose.msk.msra.mxu0 %vm4339_vm7, %v3448_v18  ;;  %3240 = vmatprep.mubr.msk.f32.mxu0 %vm3880_vm3, %v3879_v47  ;;  %v3455_v18 = vpack.c.bf16 %v2262_v17, %v2261_v16  ;;  %v2692_v16 = vld [vmem:[%s4590_s18 + $0x78] sm:$0xff] }
 0xd03   :  { %3457 = vmatprep.subr.bf16.mxu0 %v3881_v20 }
 0xd09   :  { %3241 = vmatmul.mubr.msk.f32.vlgmr.msra.gmra.mrb[26].mxu0 %vm296_vm1, %v2087_v19 }
 0xd0a   :  { %3261 = vmatprep.mubr.msk.f32.mxu0 %vm3880_vm3, %v3879_v47 }
 0xdcc   :  { %v4409_v54 = vpop.f32.mrb[22].mxu0 }
 0xdcd   :  { %v3207_v22 = vpop.f32.mrb[23].mxu0 }
 0xdd4   :  { %v1839_v23 = vpop.f32.mrb[24].mxu0 }
 0xdd5   :  { %v1843_v24 = vsel %vm1671_vm8, %v1839_v23, -1e+30  ;;  %v3214_v25 = vpop.f32.mrb[25].mxu0 }
 0xdd6   :  { %v1844_v26 = vsel %vm1258_vm6, %v1843_v24, -inf }
 0xdd7   :  { %1845 = vmax.xlane.f32.xlu1 %v1844_v26 }
 0xddc   :  { %v2164_v27 = vpop.f32.mrb[26].mxu0 }
 0xddd   :  { %v3242_v28 = vpop.f32.mrb[27].mxu0  ;;  %v2168_v36 = vsel %vm1671_vm8, %v2164_v27, -1e+30 }
 0xdde   :  { %v2169_v37 = vsel %vm1258_vm6, %v2168_v36, -inf }
 0xe64   :  { %v1846_v30 = vpop.xlane.xlu1 %1845 }
 0xe65   :  { %v1847_v31 = vsub.f32 %v1843_v24, %v1846_v30 }
 0xe67   :  { %v1848_v53 = vmul.f32 1.442695, %v1847_v31 }
 0xe69   :  { %3567 = vpow2.f32 %v1848_v53 }
 0xe73   :  { %v3568_v33 = vpop.eup %3567 }
 0xe74   :  { %v1850_v34 = vmul.f32 %v3568_v33, %v4224_v21 }
 0xe76   :  { %v1851_v35 = vsel %vm1258_vm6, %v1850_v34, 0.0 }
 0xe77   :  { %1852 = vadd.xlane.f32.xlu1 %v1851_v35  ;;  %v2513_v35 = vld [vmem:[#allocation13 + $0x38] sm:$0xff] }
 0xe88   :  { %3547 = vrot.lane.b32.xlu1 %v4345_v32, %s3884_s11 }
 0xe8c   :  { %2337 = vrot.lane.b32.xlu1 %v4373_v51, %s3884_s11 }
 0xeb0   :  { %2170 = vmax.xlane.f32.xlu1 %v2169_v37 }
 0xf04   :  { %v1853_v38 = vpop.xlane.xlu1 %1852 }
 0xf05   :  { %v1854_v39 = vmax.f32 %v1853_v38, 1e-30  ;;  %v2588_v38 = vld [vmem:[#allocation14] sm:$0xff] }
 0xf07   :  { %3569 = vrcp.f32 %v1854_v39  ;;  %v2589_v39 = vld [vmem:[#allocation14 + $0x8] sm:$0xff] }
 0xf08   :  { %v3548_v40 = vpop.permute.xlu1 %3547 }
 0xf09   :  { %v3550_v41 = vunpack.i.h.bf16 %v3548_v40  ;;  %v3549_v43 = vunpack.i.l.bf16 %v3548_v40  ;;  %v2590_v40 = vld [vmem:[#allocation14 + $0x10] sm:$0xff] }
 0xf0b   :  { %v3458_v44 = vpack.c.bf16 %v3550_v41, %v3549_v43  ;;  %v3468_v41 = vpack.c.bf16 %v2589_v39, %v2588_v38  ;;  %v2591_v43 = vld [vmem:[#allocation14 + $0x18] sm:$0xff] }
 0xf0c   :  { %v2338_v48 = vpop.permute.xlu1 %2337 }
 0xf0d   :  { %3460 = vmatpush3.bf16.xpose.msk.msra.mxu0 %vm4339_vm7, %v3458_v44  ;;  %v3471_v44 = vpack.c.bf16 %v2591_v43, %v2590_v40  ;;  %v1242_v43 = vsub.f32 1.0, %v4440_v61 }
 0xf0e   :  { %3467 = vmatprep.subr.bf16.mxu0 %v3881_v20 }
 0xf11   :  { %v3570_v32 = vpop.eup %3569 }
 0xf12   :  { %v1856_v45 = vmul.f32 %v3570_v32, %v1850_v34  ;;  %v2512_v34 = vld [vmem:[#allocation13 + $0x30] sm:$0xff]  ;;  %v2592_v32 = vld [vmem:[#allocation14 + $0x20] sm:$0xff] }
 0xf14   :  { %3220 = vmatmul.mubr.msk.f32.vlgmr.msra.gmra.mrb[16].mxu1 %vm296_vm1, %v1856_v45  ;;  %3262 = vmatmul.mubr.msk.f32.vlgmr.msra.gmra.mrb[28].mxu0 %vm296_vm1, %v2338_v48  ;;  %v2593_v45 = vld [vmem:[#allocation14 + $0x28] sm:$0xff] }
 0xf15   :  { %3226 = vmatprep.mubr.msk.f32.mxu1 %vm3880_vm3, %v3879_v47  ;;  %3294 = vmatprep.mubr.msk.f32.mxu0 %vm3880_vm3, %v3879_v47  ;;  %v3474_v48 = vpack.c.bf16 %v2593_v45, %v2592_v32 }
 0xf16   :  { %3443 = vmatpush3.bf16.msra.mxu1 %v3442_v59  ;;  %3469 = vmatpush3.bf16.msra.mxu0 %v3468_v41 }
 0xf17   :  { %3444 = vmatprep.subr.bf16.mxu1 %v3881_v20  ;;  %3470 = vmatprep.subr.bf16.mxu0 %v3881_v20 }
 0xf1a   :  { %3472 = vmatpush3.bf16.msra.mxu0 %v3471_v44 }
 0xf1b   :  { %3473 = vmatprep.subr.bf16.mxu0 %v3881_v20 }
 0xf1e   :  { %3475 = vmatpush3.bf16.msra.mxu0 %v3474_v48 }
 0xf1f   :  { %3476 = vmatprep.subr.bf16.mxu0 %v3881_v20 }
 0xf3d   :  { %v2171_v50 = vpop.xlane.xlu1 %2170 }
 0xf3e   :  { %v2172_v51 = vsub.f32 %v2168_v36, %v2171_v50  ;;  %v3465_v36 = vpack.c.bf16 %v2513_v35, %v2512_v34  ;;  %v2594_v50 = vld [vmem:[#allocation14 + $0x30] sm:$0xff] }
 0xf40   :  { %v2173_v52 = vmul.f32 1.442695, %v2172_v51  ;;  %v2595_v51 = vld [vmem:[#allocation14 + $0x38] sm:$0xff] }
 0xf42   :  { %3571 = vpow2.f32 %v2173_v52  ;;  %v3477_v52 = vpack.c.bf16 %v2595_v51, %v2594_v50 }
 0xf44   :  { %3478 = vmatpush3.bf16.msra.mxu0 %v3477_v52 }
 0xf4c   :  { %v3572_v29 = vpop.eup %3571 }
 0xf4d   :  { %v2175_v55 = vmul.f32 %v3572_v29, %v4224_v21 }
 0xf4f   :  { %v2176_v56 = vsel %vm1258_vm6, %v2175_v55, 0.0 }
 0xf50   :  { %2177 = vadd.xlane.f32.xlu0 %v2176_v56  ;;  %v2677_v56 = vld [vmem:[%s4590_s18] sm:$0xff] }
 0xf51   :  { %v3480_v59 = vpack.c.bf16 %v2678_v57, %v2677_v56 }
 0xf66   :  { %3552 = vrot.lane.b32.xlu0 %v4371_v49, %s3883_s8 }
 0xf85   :  { %1228 = vadd.xlane.f32.xlu0 %v4445_v63 }
 0xfdd   :  { %v2178_v0 = vpop.xlane.xlu0 %2177 }
 0xfde   :  { %v2179_v1 = vmax.f32 %v2178_v0, 1e-30  ;;  %v2682_v0 = vld [vmem:[%s4590_s18 + $0x28] sm:$0xff] }
 0xfe0   :  { %3573 = vrcp.f32 %v2179_v1 }
 0xfe1   :  { %v3553_v5 = vpop.permute.xlu0 %3552 }
 0xfe2   :  { %v3555_v11 = vunpack.i.h.bf16 %v3553_v5  ;;  %v3554_v12 = vunpack.i.l.bf16 %v3553_v5  ;;  %v2685_v5 = vld [vmem:[%s4590_s18 + $0x40] sm:$0xff] }
 0xfe4   :  { %v3452_v14 = vpack.c.bf16 %v3555_v11, %v3554_v12  ;;  %v2690_v11 = vld [vmem:[%s4590_s18 + $0x68] sm:$0xff] }
 0xfe7   :  { %v1934_v4 = vpop.f32.mrb[16].mxu1  ;;  %v2415_v6 = vpop.f32.mrb[28].mxu0 }
 0xfe8   :  { %v2419_v7 = vsel %vm1671_vm8, %v2415_v6, -1e+30  ;;  %v3221_v8 = vpop.f32.mrb[17].mxu1  ;;  %3227 = vmatmul.mubr.msk.f32.vlgmr.msra.gmra.mrb[18].mxu1 %vm296_vm1, %v1934_v4  ;;  %v3263_v9 = vpop.f32.mrb[29].mxu0  ;;  %v2686_v4 = vld [vmem:[%s4590_s18 + $0x48] sm:$0xff] }
 0xfe9   :  { %v2420_v10 = vsel %vm1258_vm6, %v2419_v7, -inf  ;;  %3446 = vmatpush3.bf16.msra.mxu1 %v3445_v3  ;;  %3233 = vmatprep.mubr.msk.f32.mxu1 %vm3880_vm3, %v3879_v47  ;;  %v3489_v3 = vpack.c.bf16 %v2684_v46, %v2683_v2  ;;  %v3492_v6 = vpack.c.bf16 %v2686_v4, %v2685_v5  ;;  %v2688_v8 = vld [vmem:[%s4590_s18 + $0x58] sm:$0xff] }
 0xfea   :  { %2421 = vmax.xlane.f32.xlu1 %v2420_v10  ;;  %3451 = vmatprep.subr.bf16.mxu1 %v3881_v20  ;;  %v3574_v13 = vpop.eup %3573  ;;  %v2689_v10 = vld [vmem:[%s4590_s18 + $0x60] sm:$0xff] }
 0xfeb   :  { %v2181_v15 = vmul.f32 %v3574_v13, %v2175_v55  ;;  %v3498_v12 = vpack.c.bf16 %v2690_v11, %v2689_v10 }
 0xff0   :  { %3234 = vmatmul.mubr.msk.f32.vlgmr.msra.gmra.mrb[18].mxu1 %vm296_vm1, %v4409_v54 }
 0xff1   :  { %3453 = vmatpush3.bf16.msra.mxu1 %v3452_v14  ;;  %3247 = vmatprep.mubr.msk.f32.mxu1 %vm3880_vm3, %v3879_v47 }
 0xff2   :  { %3454 = vmatprep.subr.bf16.mxu1 %v3881_v20 }
 0xff4   :  { %3248 = vmatmul.mubr.msk.f32.vlgmr.msra.gmra.mrb[20].mxu1 %vm296_vm1, %v2181_v15  ;;  %v2691_v15 = vld [vmem:[%s4590_s18 + $0x70] sm:$0xff] }
 0xff5   :  { %3254 = vmatprep.mubr.msk.f32.mxu1 %vm3880_vm3, %v3879_v47  ;;  %3456 = vmatpush3.bf16.msra.mxu1 %v3455_v18  ;;  %v3501_v17 = vpack.c.bf16 %v2692_v16, %v2691_v15  ;;  %v2877_v18 = vld [vmem:[#allocation16] ss:$0 sm:$0xff] }
 0xff6   :  { %3461 = vmatprep.subr.bf16.mxu1 %v3881_v20 }
0x1077   :  { %v2422_v19 = vpop.xlane.xlu1 %2421 }
0x1078   :  { %v2423_v54 = vsub.f32 %v2419_v7, %v2422_v19  ;;  %v2687_v7 = vld [vmem:[%s4590_s18 + $0x50] sm:$0xff] }
0x1079   :  { %v3495_v9 = vpack.c.bf16 %v2688_v8, %v2687_v7 }
0x107a   :  { %v2424_v22 = vmul.f32 1.442695, %v2423_v54 }
0x107c   :  { %3575 = vpow2.f32 %v2424_v22 }
0x1086   :  { %v3576_v23 = vpop.eup %3575 }
0x1087   :  { %v2426_v24 = vmul.f32 %v3576_v23, %v4224_v21 }
0x1089   :  { %v2427_v25 = vsel %vm1258_vm6, %v2426_v24, 0.0 }
0x108a   :  { %2428 = vadd.xlane.f32.xlu1 %v2427_v25 }
0x109b   :  { %3557 = vrot.lane.b32.xlu1 %v4371_v49, %s3884_s11 }
0x10c7   :  { %v2257_v26 = vpop.f32.mrb[20].mxu1 }
0x10c8   :  { %v3249_v27 = vpop.f32.mrb[21].mxu1  ;;  %3255 = vmatmul.mubr.msk.f32.vlgmr.msra.gmra.mrb[18].mxu1 %vm296_vm1, %v2257_v26 }
0x10c9   :  { %3268 = vmatprep.mubr.msk.f32.mxu1 %vm3880_vm3, %v3879_v47 }
0x1117   :  { %v2429_v28 = vpop.xlane.xlu1 %2428 }
0x1118   :  { %v2430_v30 = vmax.f32 %v2429_v28, 1e-30  ;;  %v1231_v28 = vrot.slane %v4445_v63, 4 }
0x111a   :  { %3577 = vrcp.f32 %v2430_v30  ;;  %v1232_v30 = vadd.f32 %v1231_v28, %v4445_v63 }
0x111b   :  { %v3558_v31 = vpop.permute.xlu1 %3557 }
0x111c   :  { %v3560_v53 = vunpack.i.h.bf16 %v3558_v31  ;;  %v3559_v33 = vunpack.i.l.bf16 %v3558_v31  ;;  %v1233_v31 = vrot.slane %v1232_v30, 2 }
0x111e   :  { %v3462_v21 = vpack.c.bf16 %v3560_v53, %v3559_v33  ;;  %v1234_v53 = vadd.f32 %v1233_v31, %v1232_v30 }
0x1120   :  { %3463 = vmatpush3.bf16.msra.mxu1 %v3462_v21  ;;  %v1235_v33 = vrot.slane %v1234_v53, 1  ;;  %v1229_v21 = vpop.xlane.xlu0 %1228 }
0x1121   :  { %3464 = vmatprep.subr.bf16.mxu1 %v3881_v20  ;;  %v1230_v35 = vadd.f32 1e-12, %v1229_v21 }
0x1122   :  { %v1236_v34 = vadd.f32 %v1235_v33, %v1234_v53 }
0x1124   :  { %v3578_v49 = vpop.eup %3577 }
0x1125   :  { %v2432_v37 = vmul.f32 %v3578_v49, %v2426_v24  ;;  %v1237_v49 = vadd.f32 1e-12, %v1236_v34 }
0x1127   :  { %3269 = vmatmul.mubr.msk.f32.vlgmr.msra.gmra.mrb[22].mxu1 %vm296_vm1, %v2432_v37 }
0x1128   :  { %3466 = vmatpush3.bf16.msra.mxu1 %v3465_v36  ;;  %3275 = vmatprep.mubr.msk.f32.mxu1 %vm3880_vm3, %v3879_v47  ;;  %v1238_v36 = vmul.f32 %v1237_v49, %v1230_v35 }
0x1129   :  { %3479 = vmatprep.subr.bf16.mxu1 %v3881_v20 }
0x112a   :  { %3579 = vrsqrt.f32 %v1238_v36 }
0x1134   :  { %v3580_v40 = vpop.eup %3579 }
0x1135   :  { %v1240_v41 = vmul.f32 %v3580_v40, %v4369_v42 }
0x1137   :  { %v1241_v44 = vand.u32 2147483647, %v1240_v41 }
0x1139   :  { %v1243_v45 = vmul.f32 %v1242_v43, %v1241_v44 }
0x113b   :  { %v1244_v48 = vsel %vm1226_vm10, %v1243_v45, 0.0 }
0x11fa   :  { %v2508_v29 = vpop.f32.mrb[22].mxu1 }
0x11fb   :  { %v3270_v55 = vpop.f32.mrb[23].mxu1  ;;  %3276 = vmatmul.mubr.msk.f32.vlgmr.msra.gmra.mrb[18].mxu1 %vm296_vm1, %v2508_v29 }
0x11fc   :  { %3329 = vmatprep.mubr.msk.f32.mxu1 %vm3880_vm3, %v3879_v47  ;;  %3481 = vmatpush3.bf16.msra.mxu1 %v3480_v59  ;;  %v2681_v47 = vld [vmem:[%s4590_s18 + $0x20] sm:$0xff]  ;;  %s3885_s18 = smov [#allocation19]  }
0x11fd   :  { %3482 = vmatprep.subr.bf16.mxu1 %v3881_v20  ;;  %v3486_v1 = vpack.c.bf16 %v2682_v0, %v2681_v47  ;;  %s2791_s30 = sshll.u32 %s3885_s18, 4  ;;  %s2792_s30 = int_to_ptr.vmem [resolvable:$true] %s2791_s30 }
0x11fe   :  { %s3805_s29 = scalar_lea.vmem %s2792_s30, 32  ;;  %p3810_p11 = scmp.lt.s32.totalorder %s2792_s30, %s2792_s30 }
0x11ff   :  { %p3806_p10 = scmp.ne.s32.totalorder %s2792_s30, %s3805_s29  ;;  %p3811_p12 = scmp.lt.s32.totalorder %s3805_s29, %s3805_s29 }
0x1200   :  { %3484 = vmatpush3.bf16.msra.mxu1 %v3483_v62 }
0x1201   :  { %3485 = vmatprep.subr.bf16.mxu1 %v3881_v20  ;;  %p3812_p13 = por %p3811_p12, %p3810_p11 }
0x1203   :  { %p3813_p0 = pnand %p3812_p13, %p3806_p10 }
0x1204   :  { %3487 = vmatpush3.bf16.msra.mxu1 %v3486_v1 }
0x1205   :  { %3488 = vmatprep.subr.bf16.mxu1 %v3881_v20 }
0x1208   :  { %3490 = vmatpush3.bf16.msra.mxu1 %v3489_v3 }
0x1209   :  { %3491 = vmatprep.subr.bf16.mxu1 %v3881_v20 }
0x120c   :  { %3493 = vmatpush3.bf16.msra.mxu1 %v3492_v6 }
0x120d   :  { %3494 = vmatprep.subr.bf16.mxu1 %v3881_v20 }
0x1210   :  { %3496 = vmatpush3.bf16.msra.mxu1 %v3495_v9 }
0x1211   :  { %3497 = vmatprep.subr.bf16.mxu1 %v3881_v20 }
0x1214   :  { %3499 = vmatpush3.bf16.msra.mxu1 %v3498_v12 }
0x1215   :  { %3500 = vmatprep.subr.bf16.mxu1 %v3881_v20  ;;  %v2879_v20 = vld [vmem:[#allocation17] ss:$0 sm:$0xff] }
0x1218   :  { %3502 = vmatpush3.bf16.msra.mxu1 %v3501_v17 }
0x12ce   :  { %v2583_v13 = vpop.f32.mrb[18].mxu1 }
0x12cf   :  { %v3277_v14 = vpop.f32.mrb[19].mxu1  ;;  %3295 = vmatmul.mubr.msk.f32.vlgmr.msra.gmra.mrb[30].mxu0 %vm561_vm2, %v2583_v13 }
0x13a2   :  { %v2672_v19 = vpop.f32.mrb[30].mxu0 }
0x13a3   :  { %v2673_v54 = vadd.f32 %v2877_v18, %v2672_v19  ;;  %v3296_v22 = vpop.f32.mrb[31].mxu0 }
0x13a5   :  { %v2676_v23 = vmax.f32 %v2673_v54, 0.0 }
0x13a7   :  { %3330 = vmatmul.mubr.f32.vlgmr.msra.gmra.mrb[24].mxu1 %v2676_v23 }
0x147a   :  { %v2766_v24 = vpop.f32.mrb[24].mxu1 }
0x147b   :  { %v2767_v25 = vadd.f32 %v2879_v20, %v2766_v24  ;;  %v3331_v26 = vpop.f32.mrb[25].mxu1 }
0x147d   :  { %v2771_v27 = vsel %vm2770_vm11, %v2767_v25, -inf }
0x147e   :  { %2772 = vmax.xlane.f32.xlu1 %v2771_v27 }
0x150b   :  { %v2773_v37 = vpop.xlane.xlu1 %2772 }
0x150c   :  { %v2774_v38 = vsub.f32 %v2767_v25, %v2773_v37 }
0x150e   :  { %v2775_v39 = vmul.f32 1.442695, %v2774_v38 }
0x1510   :  { %3581 = vpow2.f32 %v2775_v39 }
0x151a   :  { %v3582_v63 = vpop.eup %3581 }
0x151b   :  { %v2777_v32 = vsel %vm2770_vm11, %v3582_v63, 0.0 }
0x151c   :  { %2778 = vadd.xlane.f32.xlu0 %v2777_v32 }
0x1520   :  { %1245 = vadd.xlane.f32.xlu0 %v1244_v48 }
0x15a9   :  { %v2779_v50 = vpop.xlane.xlu0 %2778 }
0x15aa   :  { %3583 = vlog2.f32 %v2779_v50 }
0x15ad   :  { %v1246_v51 = vpop.xlane.xlu0 %1245 }
0x15ae   :  { %v1247_v52 = vsel %vm819_vm4, %v1246_v51, 0.0 }
0x15af   :  { %v1248_v29 = vrot.slane %v1247_v52, 4 }
0x15b1   :  { %v1249_v55 = vadd.f32 %v1248_v29, %v1247_v52 }
0x15b3   :  { %v1250_v56 = vrot.slane %v1249_v55, 2 }
0x15b4   :  { %v3584_v42 = vpop.eup %3583 }
0x15b5   :  { %v2781_v57 = vmul.f32 0.6931472, %v3584_v42  ;;  %v1251_v61 = vadd.f32 %v1250_v56, %v1249_v55 }
0x15b7   :  { %v2782_v58 = vadd.f32 %v2781_v57, %v2773_v37  ;;  %v1252_v59 = vrot.slane %v1251_v61, 1 }
0x15b9   :  { %v1253_v60 = vadd.f32 %v1252_v59, %v1251_v61  ;;  %v2783_v62 = vsub.f32 %v2767_v25, %v2782_v58 }
0x15bb   :  { %v1254_v47 = vmul.f32 0.083333336, %v1253_v60  ;;  %2784 = vst.msk [vmem:[#allocation19] sm:$0x3] %vm2770_vm11, %v2783_v62 }
0x15bc   :  { %3816 = shalt.err (!%p3813_p0)
}
0x15bd   :  { %s3817_s24 = scalar_lea.hbm %s4592_s20, 32 }
0x15be   :  { %p3818_p1 = scmp.ne.s32.totalorder %s4592_s20, %s3817_s24  ;;  %p3821_p2 = scmp.lt.u32.totalorder %s3817_s24, %s4592_s20 }
0x15c0   :  { %p3823_p3 = pnand %p3821_p2, %p3818_p1 }
0x15c2   :  { %3826 = shalt.err (!%p3823_p3)
}
0x15c3   :  { %2794 = dma.vmem_to_hbm [thread:$0]  %s2792_s30, 32, %s4592_s20, [#allocation4]   ;;  %1256 = vst.msk [vmem:[#allocation20] sm:$0x1] %vm1255_vm12, %v1254_v47 }
0x15c4   :  { %s3827_s1 = scalar_lea.vmem %s2802_s7, 16  ;;  %s3831_s26 = scalar_lea.vmem %s2802_s7, 32 }
0x15c5   :  { %p3828_p4 = scmp.ne.s32.totalorder %s2802_s7, %s3827_s1  ;;  %p3832_p5 = scmp.lt.s32.totalorder %s2802_s7, %s2802_s7 }
0x15c6   :  { %p3833_p6 = scmp.lt.s32.totalorder %s3831_s26, %s3827_s1 }
0x15c8   :  { %p3834_p7 = por %p3833_p6, %p3832_p5 }
0x15ca   :  { %p3835_p8 = pnand %p3834_p7, %p3828_p4 }
0x15cc   :  { %3838 = shalt.err (!%p3835_p8)
}
0x15cd   :  { %s3839_s16 = scalar_lea.hbm %s4593_s21, 16 }
0x15ce   :  { %p3840_p9 = scmp.ne.s32.totalorder %s4593_s21, %s3839_s16  ;;  %p3843_p10 = scmp.lt.u32.totalorder %s3839_s16, %s4593_s21 }
0x15d0   :  { %p3845_p11 = pnand %p3843_p10, %p3840_p9 }
0x15d2   :  { %3848 = shalt.err (!%p3845_p11)
}
0x15d3   :  { %2804 = dma.vmem_to_hbm [thread:$0]  %s2802_s7, 16, %s4593_s21, [#allocation21]  }
0x15d4   :  { %3861 = dma.done.wait [#allocation4], 32  }
0x15d5   :  { %3862 = vsyncadd [#allocation4], 4294967264 }
0x15d6   :  { %3863 = dma.done.wait [#allocation21], 16  }
0x15d7   :  { %3864 = vsyncadd [#allocation21], 4294967280 }
0x15d8   :  { %2811 = vsyncpa [#allocation3], 1 }
0x15d9   :  { %2812 = vsyncpa [#allocation6], 1 }
0x15da   :  { %2813 = vsyncpa [#allocation9], 1 }
0x15db   :  { %2814 = vsyncpa [#allocation12], 1 }
0x15dc   :  { %2815 = vsyncpa [#allocation15], 1 }
0x15dd   :  { %2816 = vsyncpa [#allocation18], 1 }
0x15de   :  { %2817 = vsyncpa [#allocation4], 1 }
0x15df   :  { %2818 = vsyncpa [#allocation21], 1 }

</bundles_post_ra>
